<compile_context>
chip_gen: v6e
topology: v6e:2x2x1
jax: 0.10.0
libtpu: 0.0.40
codegen_flags: <defaults>
</compile_context>

<pallas_src>
import functools
import math

import numpy as np
import jax
import jax.numpy as jnp
from jax import lax
from jax.experimental import pallas as pl
from jax.experimental.pallas import tpu as pltpu

COMPUTE_DTYPE = jnp.bfloat16   # MXU operand dtype (f32 accumulation everywhere)
ACT_DTYPE = jnp.bfloat16       # activation dtype carried between pallas_calls
LN_EPS = 1e-5

# Preferred tile sizes (MXU-width multiples; 256-friendly for v6e/v7x, still
# fine on v5e; re-derived against VMEM by vmem_limit_bytes below).
SQ_TILE_PREF = 256
SK_TILE_PREF = 512
FF_TILE_PREF = 512


def _pick_tile(dim, preferred, align):
    """Largest `align`-multiple divisor of `dim` that is <= preferred, else dim."""
    if dim <= preferred:
        return dim
    t = (preferred // align) * align
    while t >= align:
        if dim % t == 0:
            return t
        t -= align
    return dim   # fall back to the whole (untiled) dimension


def _layernorm(z, gamma, beta):
    mu = jnp.mean(z, axis=-1, keepdims=True)
    var = jnp.mean(jnp.square(z - mu), axis=-1, keepdims=True)
    return (z - mu) * lax.rsqrt(var + LN_EPS) * gamma + beta


def _compiler_params(dims, block_bytes):
    # Scoped-VMEM limit = computed per-step footprint + headroom; never below
    # the 32 MiB default, capped below physical capacity.
    vmem = int(min(max(2 * block_bytes + (2 << 20), 32 << 20), 100 << 20))
    return pltpu.CompilerParams(dimension_semantics=dims,
                                vmem_limit_bytes=vmem)


def _const_spec(shape):
    """BlockSpec for a grid-invariant block: single-buffered (halves its VMEM)."""
    n = len(shape)
    index_map = lambda *idx: (0,) * n
    try:
        return pl.BlockSpec(shape, index_map, pipeline_mode=pl.Buffered(1))
    except (TypeError, AttributeError):   # fallback for JAX without pipeline_mode
        return pl.BlockSpec(shape, index_map)


# ---------------------------------------------------------------------------
# Kernels
# ---------------------------------------------------------------------------

def attention_block_kernel(xq_ref, xkv_ref, mask_ref,
                           wq_ref, bq_ref, wkv_ref, bkv_ref, wo_ref, bo_ref,
                           g_ref, b_ref, o_ref,
                           q_scr, acc_scr, m_scr, l_scr,
                           *, num_heads, scale):
    """One (batch, Sq-tile, Sk-tile) step of the fused attention block.

    Fuses Q/[K|V] projections, per-head flash attention (online softmax over
    the Sk grid axis), output projection, residual add and LayerNorm.
    """
    D = wq_ref.shape[0]
    dh = D // num_heads
    k_step = pl.program_id(2)

    @pl.when(k_step == 0)
    def _init():
        x_q = xq_ref[...].astype(COMPUTE_DTYPE)
        q_scr[...] = jnp.dot(x_q, wq_ref[...].astype(COMPUTE_DTYPE),
                             preferred_element_type=jnp.float32) + bq_ref[...]
        acc_scr[...] = jnp.zeros_like(acc_scr)
        m_scr[...] = jnp.full_like(m_scr, -jnp.inf)
        l_scr[...] = jnp.zeros_like(l_scr)

    # Fused K|V projection for this Sk tile (bf16 MXU operands, f32 acc).
    kv = jnp.dot(xkv_ref[...].astype(COMPUTE_DTYPE),
                 wkv_ref[...].astype(COMPUTE_DTYPE),
                 preferred_element_type=jnp.float32) + bkv_ref[...]
    mask_add = mask_ref[...]                       # (sq_t, sk_t), already *(-1e9)

    # Per-head online-softmax update.  Head outputs accumulate directly into
    # the lane-dense (sq_t, D) scratch (no list + concatenate).
    dn = (((1,), (1,)), ((), ()))                  # contract last dims (no k.T)
    for h in range(num_heads):
        sl = slice(h * dh, (h + 1) * dh)
        qh = q_scr[:, sl].astype(COMPUTE_DTYPE)
        kh = kv[:, sl].astype(COMPUTE_DTYPE)
        vh = kv[:, D + h * dh:D + (h + 1) * dh].astype(COMPUTE_DTYPE)

        s = lax.dot_general(qh, kh, dn, preferred_element_type=jnp.float32)
        s = s * scale + mask_add                   # (sq_t, sk_t)

        m_prev = m_scr[:, h:h + 1]
        m_new = jnp.maximum(m_prev, jnp.max(s, axis=-1, keepdims=True))
        alpha = jnp.exp(m_prev - m_new)
        p = jnp.exp(s - m_new)
        l_scr[:, h:h + 1] = (alpha * l_scr[:, h:h + 1]
                             + jnp.sum(p, axis=-1, keepdims=True))
        acc_scr[:, sl] = alpha * acc_scr[:, sl] + jnp.dot(
            p.astype(COMPUTE_DTYPE), vh, preferred_element_type=jnp.float32)
        m_scr[:, h:h + 1] = m_new

    @pl.when(k_step == pl.num_programs(2) - 1)
    def _finalize():
        # Normalize each head in the scratch (softmax denominator on the EUP).
        for h in range(num_heads):
            sl = slice(h * dh, (h + 1) * dh)
            acc_scr[:, sl] = acc_scr[:, sl] * pl.reciprocal(
                l_scr[:, h:h + 1], approx=True)
        # Output projection + residual + LayerNorm epilogue (single store).
        proj = jnp.dot(acc_scr[...].astype(COMPUTE_DTYPE),
                       wo_ref[...].astype(COMPUTE_DTYPE),
                       preferred_element_type=jnp.float32) + bo_ref[...]
        z = xq_ref[...].astype(jnp.float32) + proj
        o_ref[...] = _layernorm(z, g_ref[...], b_ref[...]).astype(o_ref.dtype)


def ffn_block_kernel(x_ref, w1_ref, b1_ref, w2_ref, b2_ref, g_ref, b_ref,
                     o_ref, acc_scr):
    """One (batch, Sq-tile, d_ff-tile) step of Linear->ReLU->Linear + res + LN."""
    k_step = pl.program_id(2)

    @pl.when(k_step == 0)
    def _init():
        acc_scr[...] = jnp.zeros_like(acc_scr)

    x = x_ref[...].astype(COMPUTE_DTYPE)
    h = jnp.dot(x, w1_ref[...].astype(COMPUTE_DTYPE),
                preferred_element_type=jnp.float32) + b1_ref[...]
    h = jnp.maximum(h, 0.0)                        # ReLU (exact per d_ff tile)
    acc_scr[...] += jnp.dot(h.astype(COMPUTE_DTYPE),
                            w2_ref[...].astype(COMPUTE_DTYPE),
                            preferred_element_type=jnp.float32)

    @pl.when(k_step == pl.num_programs(2) - 1)
    def _finalize():
        y = acc_scr[...] + b2_ref[...]
        z = x_ref[...].astype(jnp.float32) + y
        o_ref[...] = _layernorm(z, g_ref[...], b_ref[...]).astype(o_ref.dtype)


# ---------------------------------------------------------------------------
# pallas_call wrappers
# ---------------------------------------------------------------------------

def fused_attention_block(x_q, x_kv, mask_add, p, gamma, beta, num_heads,
                          out_dtype):
    B, Sq, D = x_q.shape
    Sk = x_kv.shape[1]
    dh = D // num_heads
    scale = 1.0 / math.sqrt(float(dh))

    sq_t = _pick_tile(Sq, SQ_TILE_PREF, 8)
    sk_t = _pick_tile(Sk, SK_TILE_PREF, 128)
    n_sq = Sq // sq_t
    n_sk = Sk // sk_t

    kernel = functools.partial(attention_block_kernel,
                               num_heads=num_heads, scale=scale)
    out_isz = np.dtype(out_dtype).itemsize

    flops = int(2 * B * Sq * D * D                      # q projection
                + 2 * B * n_sq * Sk * D * (2 * D)       # fused k|v proj (per Sq tile)
                + 4 * B * Sq * Sk * D                   # q.k^T and p@v
                + 2 * B * Sq * D * D)                   # output projection
    transcendentals = int(B * num_heads * Sq * Sk)
    bytes_accessed = int(x_q.dtype.itemsize * B * Sq * D
                         + x_kv.dtype.itemsize * B * n_sq * Sk * D
                         + 4 * Sq * Sk
                         + 2 * (D * D + D * 2 * D + D * D)
                         + 4 * 8 * D
                         + out_isz * B * Sq * D)

    # Per-grid-step VMEM footprint (drives vmem_limit_bytes).
    block_bytes = int(
        2 * sq_t * D * x_q.dtype.itemsize              # x_q (double-buffered)
        + 2 * sk_t * D * x_kv.dtype.itemsize           # x_kv (double-buffered)
        + 2 * sq_t * sk_t * 4                          # additive mask
        + 2 * (D * D + D * 2 * D + D * D)              # bf16 weights (single-buffered)
        + 4 * 8 * D                                    # biases + LN params
        + 2 * sq_t * D * out_isz                       # output block
        + 4 * (2 * sq_t * D + 2 * sq_t * num_heads))   # f32 scratch (q, acc, m, l)

    return pl.pallas_call(
        kernel,
        out_shape=jax.ShapeDtypeStruct((B, Sq, D), out_dtype),
        grid=(B, n_sq, n_sk),
        in_specs=[
            pl.BlockSpec((None, sq_t, D), lambda b, i, k: (b, i, 0)),   # x_q
            pl.BlockSpec((None, sk_t, D), lambda b, i, k: (b, k, 0)),   # x_kv
            pl.BlockSpec((sq_t, sk_t), lambda b, i, k: (i, k)),         # mask*(-1e9)
            _const_spec((D, D)),          # wq
            _const_spec((1, D)),          # bq
            _const_spec((D, 2 * D)),      # wkv (fused k|v)
            _const_spec((1, 2 * D)),      # bkv
            _const_spec((D, D)),          # wo
            _const_spec((1, D)),          # bo
            _const_spec((1, D)),          # ln gamma
            _const_spec((1, D)),          # ln beta
        ],
        out_specs=pl.BlockSpec((None, sq_t, D), lambda b, i, k: (b, i, 0)),
        scratch_shapes=[
            pltpu.VMEM((sq_t, D), jnp.float32),            # q projection
            pltpu.VMEM((sq_t, D), jnp.float32),            # attention accumulator
            pltpu.VMEM((sq_t, num_heads), jnp.float32),    # running max (per head)
            pltpu.VMEM((sq_t, num_heads), jnp.float32),    # running denom (per head)
        ],
        compiler_params=_compiler_params(
            ("parallel", "parallel", "arbitrary"), block_bytes),
        cost_estimate=pl.CostEstimate(flops=flops,
                                      transcendentals=transcendentals,
                                      bytes_accessed=bytes_accessed),
    )(x_q, x_kv, mask_add, p["wq"], p["bq"], p["wkv"], p["bkv"],
      p["wo"], p["bo"], gamma, beta)


def fused_ffn_block(x, p, gamma, beta, out_dtype):
    B, S, D = x.shape
    F_ = p["w1"].shape[1]

    sq_t = _pick_tile(S, SQ_TILE_PREF, 8)
    ff_t = _pick_tile(F_, FF_TILE_PREF, 128)
    n_sq = S // sq_t
    n_ff = F_ // ff_t
    out_isz = np.dtype(out_dtype).itemsize

    flops = int(4 * B * S * D * F_)
    bytes_accessed = int(x.dtype.itemsize * B * S * D
                         + 2 * 2 * D * F_ * B * n_sq        # streamed w1/w2 tiles
                         + 4 * (F_ + 3 * D)
                         + out_isz * B * S * D)

    block_bytes = int(
        2 * sq_t * D * x.dtype.itemsize                 # x (double-buffered)
        + 2 * 2 * (D * ff_t + ff_t * D)                 # bf16 w1/w2 tiles (double-buffered)
        + 2 * 4 * ff_t                                  # f32 b1 tile (double-buffered)
        + 4 * 3 * D                                     # b2 + LN params (single-buffered)
        + 2 * sq_t * D * out_isz                        # output block
        + 4 * sq_t * D)                                 # f32 accumulator scratch

    return pl.pallas_call(
        ffn_block_kernel,
        out_shape=jax.ShapeDtypeStruct((B, S, D), out_dtype),
        grid=(B, n_sq, n_ff),
        in_specs=[
            pl.BlockSpec((None, sq_t, D), lambda b, i, k: (b, i, 0)),   # x
            pl.BlockSpec((D, ff_t), lambda b, i, k: (0, k)),            # w1 tile
            pl.BlockSpec((1, ff_t), lambda b, i, k: (0, k)),            # b1 tile
            pl.BlockSpec((ff_t, D), lambda b, i, k: (k, 0)),            # w2 tile
            _const_spec((1, D)),    # b2
            _const_spec((1, D)),    # ln gamma
            _const_spec((1, D)),    # ln beta
        ],
        out_specs=pl.BlockSpec((None, sq_t, D), lambda b, i, k: (b, i, 0)),
        scratch_shapes=[pltpu.VMEM((sq_t, D), jnp.float32)],
        compiler_params=_compiler_params(
            ("parallel", "parallel", "arbitrary"), block_bytes),
        cost_estimate=pl.CostEstimate(flops=flops, transcendentals=0,
                                      bytes_accessed=bytes_accessed),
    )(x, p["w1"], p["b1"], p["w2"], p["b2"], gamma, beta)


def decoder_layer(x, enc_output, src_mask, tgt_mask, params, num_heads):
    # Precompute additive masks once (mask * -1e9), matching the PyTorch code.
    tgt_add = (tgt_mask * (-1.0e9)).astype(jnp.float32)
    src_add = (src_mask * (-1.0e9)).astype(jnp.float32)
    # Self-attention + residual + LN (one fused pallas_call; bf16 activation out).
    x = fused_attention_block(x, x, tgt_add, params["mha1"],
                              params["ln1_g"], params["ln1_b"], num_heads,
                              out_dtype=ACT_DTYPE)
    # Cross-attention + residual + LN.
    x = fused_attention_block(x, enc_output, src_add, params["mha2"],
                              params["ln2_g"], params["ln2_b"], num_heads,
                              out_dtype=ACT_DTYPE)
    # Position-wise FFN + residual + LN; final layer output back in f32.
    x = fused_ffn_block(x, params["ffn"], params["ln3_g"], params["ln3_b"],
                        out_dtype=jnp.float32)
    return x


# ---------------------------------------------------------------------------
# Deterministic parameter construction
# ---------------------------------------------------------------------------

def init_params(key, d_model, d_ff):
    keys = jax.random.split(key, 10)

    def wmat(k, d_in, d_out):
        # weight matrices stored bf16 (MXU operand dtype); biases stay f32
        return (jax.random.normal(k, (d_in, d_out), jnp.float32) * 0.02
                ).astype(COMPUTE_DTYPE)

    def mha_params(ks):
        wq = wmat(ks[0], d_model, d_model)
        wk = wmat(ks[1], d_model, d_model)
        wv = wmat(ks[2], d_model, d_model)
        wo = wmat(ks[3], d_model, d_model)
        return dict(
            wq=wq, bq=jnp.zeros((1, d_model), jnp.float32),
            wkv=jnp.concatenate([wk, wv], axis=1),           # fused (D, 2D)
            bkv=jnp.zeros((1, 2 * d_model), jnp.float32),
            wo=wo, bo=jnp.zeros((1, d_model), jnp.float32),
        )

    ffn = dict(
        w1=wmat(keys[8], d_model, d_ff), b1=jnp.zeros((1, d_ff), jnp.float32),
        w2=wmat(keys[9], d_ff, d_model), b2=jnp.zeros((1, d_model), jnp.float32),
    )

    ones = jnp.ones((1, d_model), jnp.float32)
    zeros = jnp.zeros((1, d_model), jnp.float32)
    return dict(
        mha1=mha_params(keys[0:4]),
        mha2=mha_params(keys[4:8]),
        ffn=ffn,
        ln1_g=ones, ln1_b=zeros,
        ln2_g=ones, ln2_b=zeros,
        ln3_g=ones, ln3_b=zeros,
    )


# ---------------------------------------------------------------------------

if __name__ == "__main__":
    B, S, S_enc = 2, 8, 8
    d_model, num_heads, d_ff = 32, 4, 64

    root = jax.random.PRNGKey(0)
    k_x, k_enc, k_p = jax.random.split(root, 3)

    x = jax.random.normal(k_x, (B, S, d_model), jnp.float32)
    enc_output = jax.random.normal(k_enc, (B, S_enc, d_model), jnp.float32)

    # masks: 1 = masked position (added as mask * -1e9 to the logits)
    tgt_mask = jnp.triu(jnp.ones((S, S), jnp.float32), k=1)   # causal
    src_mask = jnp.zeros((S, S_enc), jnp.float32)             # no masking

    params = init_params(k_p, d_model, d_ff)

    out = decoder_layer(x, enc_output, src_mask, tgt_mask, params, num_heads)
    jax.block_until_ready(out)
    assert out.shape == (B, S, d_model)
    assert out.dtype == jnp.float32
    print("KERNEL_OK")
</pallas_src>

<mosaic_0001>
module attributes {stable_mosaic.version = 11 : i64} {
  func.func @attention_block_kernel(%arg0: i32, %arg1: i32, %arg2: i32, %arg3: memref<1x8x32xf32, #tpu.memory_space<vmem>>, %arg4: memref<1x8x32xf32, #tpu.memory_space<vmem>>, %arg5: memref<8x8xf32, #tpu.memory_space<vmem>>, %arg6: memref<32x32xbf16, #tpu.memory_space<vmem>>, %arg7: memref<1x32xf32, #tpu.memory_space<vmem>>, %arg8: memref<32x64xbf16, #tpu.memory_space<vmem>>, %arg9: memref<1x64xf32, #tpu.memory_space<vmem>>, %arg10: memref<32x32xbf16, #tpu.memory_space<vmem>>, %arg11: memref<1x32xf32, #tpu.memory_space<vmem>>, %arg12: memref<1x32xf32, #tpu.memory_space<vmem>>, %arg13: memref<1x32xf32, #tpu.memory_space<vmem>>, %arg14: memref<1x8x32xbf16, #tpu.memory_space<vmem>>, %arg15: memref<8x32xf32, #tpu.memory_space<vmem>>, %arg16: memref<8x32xf32, #tpu.memory_space<vmem>>, %arg17: memref<8x4xf32, #tpu.memory_space<vmem>>, %arg18: memref<8x4xf32, #tpu.memory_space<vmem>>) attributes {dimension_semantics = [#tpu.dimension_semantics<parallel>, #tpu.dimension_semantics<parallel>, #tpu.dimension_semantics<arbitrary>], iteration_bounds = array<i64: 2, 1, 1>, scalar_prefetch = 0 : i64, scratch_operands = 4 : i64, tpu.core_type = #tpu.core_type<tc>, window_params = [{transform_indices = @transform_0, window_bounds = array<i64: 1, 8, 32>}, {transform_indices = @transform_1, window_bounds = array<i64: 1, 8, 32>}, {transform_indices = @transform_2, window_bounds = array<i64: 8, 8>}, {pipeline_mode = #tpu.pipeline_mode<synchronous>, transform_indices = @transform_3, window_bounds = array<i64: 32, 32>}, {pipeline_mode = #tpu.pipeline_mode<synchronous>, transform_indices = @transform_4, window_bounds = array<i64: 1, 32>}, {pipeline_mode = #tpu.pipeline_mode<synchronous>, transform_indices = @transform_5, window_bounds = array<i64: 32, 64>}, {pipeline_mode = #tpu.pipeline_mode<synchronous>, transform_indices = @transform_6, window_bounds = array<i64: 1, 64>}, {pipeline_mode = #tpu.pipeline_mode<synchronous>, transform_indices = @transform_7, window_bounds = array<i64: 32, 32>}, {pipeline_mode = #tpu.pipeline_mode<synchronous>, transform_indices = @transform_8, window_bounds = array<i64: 1, 32>}, {pipeline_mode = #tpu.pipeline_mode<synchronous>, transform_indices = @transform_9, window_bounds = array<i64: 1, 32>}, {pipeline_mode = #tpu.pipeline_mode<synchronous>, transform_indices = @transform_10, window_bounds = array<i64: 1, 32>}, {transform_indices = @transform_11, window_bounds = array<i64: 1, 8, 32>}]} {
    %c0_i32 = arith.constant 0 : i32
    %0 = arith.cmpi eq, %arg2, %c0_i32 : i32
    %1 = arith.extui %0 : i1 to i32
    %c0_i32_0 = arith.constant 0 : i32
    %2 = arith.cmpi ne, %1, %c0_i32_0 : i32
    scf.if %2 {
      %c0_81 = arith.constant 0 : index
      %c0_82 = arith.constant 0 : index
      %c0_83 = arith.constant 0 : index
      %147 = vector.load %arg3[%c0_81, %c0_82, %c0_83] : memref<1x8x32xf32, #tpu.memory_space<vmem>>, vector<1x8x32xf32>
      %148 = vector.shape_cast %147 : vector<1x8x32xf32> to vector<8x32xf32>
      %149 = arith.truncf %148 : vector<8x32xf32> to vector<8x32xbf16>
      %c0_84 = arith.constant 0 : index
      %c0_85 = arith.constant 0 : index
      %150 = vector.load %arg6[%c0_84, %c0_85] : memref<32x32xbf16, #tpu.memory_space<vmem>>, vector<32x32xbf16>
      %cst_86 = arith.constant dense<0.000000e+00> : vector<8x32xf32>
      %151 = tpu.matmul %149, %150, %cst_86 {dimension_numbers = #tpu.dot_dimension_numbers<[1], [0], [0], [1], [0, 0, 1, 1], [], []>} : vector<8x32xbf16>, vector<32x32xbf16>, vector<8x32xf32> -> vector<8x32xf32>
      %c0_87 = arith.constant 0 : index
      %c0_88 = arith.constant 0 : index
      %152 = vector.load %arg7[%c0_87, %c0_88] : memref<1x32xf32, #tpu.memory_space<vmem>>, vector<1x32xf32>
      %153 = vector.broadcast %152 : vector<1x32xf32> to vector<8x32xf32>
      %154 = arith.addf %151, %153 : vector<8x32xf32>
      %c0_89 = arith.constant 0 : index
      %c0_90 = arith.constant 0 : index
      %155 = vector.load %arg15[%c0_89, %c0_90] : memref<8x32xf32, #tpu.memory_space<vmem>>, vector<8x32xf32>
      tpu.vector_store %arg15[%c0_89, %c0_90], %154 {strides = array<i32>} : memref<8x32xf32, #tpu.memory_space<vmem>>, vector<8x32xf32>,
      %cst_91 = arith.constant 0.000000e+00 : f32
      %156 = vector.broadcast %cst_91 : f32 to vector<8x32xf32>
      %c0_92 = arith.constant 0 : index
      %c0_93 = arith.constant 0 : index
      %157 = vector.load %arg16[%c0_92, %c0_93] : memref<8x32xf32, #tpu.memory_space<vmem>>, vector<8x32xf32>
      tpu.vector_store %arg16[%c0_92, %c0_93], %156 {strides = array<i32>} : memref<8x32xf32, #tpu.memory_space<vmem>>, vector<8x32xf32>,
      %cst_94 = arith.constant 0xFF800000 : f32
      %158 = vector.broadcast %cst_94 : f32 to vector<8x4xf32>
      %c0_95 = arith.constant 0 : index
      %c0_96 = arith.constant 0 : index
      %159 = vector.load %arg17[%c0_95, %c0_96] : memref<8x4xf32, #tpu.memory_space<vmem>>, vector<8x4xf32>
      tpu.vector_store %arg17[%c0_95, %c0_96], %158 {strides = array<i32>} : memref<8x4xf32, #tpu.memory_space<vmem>>, vector<8x4xf32>,
      %cst_97 = arith.constant 0.000000e+00 : f32
      %160 = vector.broadcast %cst_97 : f32 to vector<8x4xf32>
      %c0_98 = arith.constant 0 : index
      %c0_99 = arith.constant 0 : index
      %161 = vector.load %arg18[%c0_98, %c0_99] : memref<8x4xf32, #tpu.memory_space<vmem>>, vector<8x4xf32>
      tpu.vector_store %arg18[%c0_98, %c0_99], %160 {strides = array<i32>} : memref<8x4xf32, #tpu.memory_space<vmem>>, vector<8x4xf32>,
    } else {
    }
    %c0 = arith.constant 0 : index
    %c0_1 = arith.constant 0 : index
    %c0_2 = arith.constant 0 : index
    %3 = vector.load %arg4[%c0, %c0_1, %c0_2] : memref<1x8x32xf32, #tpu.memory_space<vmem>>, vector<1x8x32xf32>
    %4 = vector.shape_cast %3 : vector<1x8x32xf32> to vector<8x32xf32>
    %5 = arith.truncf %4 : vector<8x32xf32> to vector<8x32xbf16>
    %c0_3 = arith.constant 0 : index
    %c0_4 = arith.constant 0 : index
    %6 = vector.load %arg8[%c0_3, %c0_4] : memref<32x64xbf16, #tpu.memory_space<vmem>>, vector<32x64xbf16>
    %cst = arith.constant dense<0.000000e+00> : vector<8x64xf32>
    %7 = tpu.matmul %5, %6, %cst {dimension_numbers = #tpu.dot_dimension_numbers<[1], [0], [0], [1], [0, 0, 1, 1], [], []>} : vector<8x32xbf16>, vector<32x64xbf16>, vector<8x64xf32> -> vector<8x64xf32>
    %c0_5 = arith.constant 0 : index
    %c0_6 = arith.constant 0 : index
    %8 = vector.load %arg9[%c0_5, %c0_6] : memref<1x64xf32, #tpu.memory_space<vmem>>, vector<1x64xf32>
    %9 = vector.broadcast %8 : vector<1x64xf32> to vector<8x64xf32>
    %10 = arith.addf %7, %9 : vector<8x64xf32>
    %c0_7 = arith.constant 0 : index
    %c0_8 = arith.constant 0 : index
    %11 = vector.load %arg5[%c0_7, %c0_8] : memref<8x8xf32, #tpu.memory_space<vmem>>, vector<8x8xf32>
    %c0_9 = arith.constant 0 : index
    %c0_10 = arith.constant 0 : index
    %12 = vector.load %arg15[%c0_9, %c0_10] : memref<8x32xf32, #tpu.memory_space<vmem>>, vector<8x8xf32>
    %13 = arith.truncf %12 : vector<8x8xf32> to vector<8x8xbf16>
    %14 = vector.extract_strided_slice %10 {offsets = [0, 0], sizes = [8, 8], strides = [1, 1]} : vector<8x64xf32> to vector<8x8xf32>
    %15 = arith.truncf %14 : vector<8x8xf32> to vector<8x8xbf16>
    %16 = vector.extract_strided_slice %10 {offsets = [0, 32], sizes = [8, 8], strides = [1, 1]} : vector<8x64xf32> to vector<8x8xf32>
    %17 = arith.truncf %16 : vector<8x8xf32> to vector<8x8xbf16>
    %cst_11 = arith.constant dense<0.000000e+00> : vector<8x8xf32>
    %18 = tpu.matmul %13, %15, %cst_11 {dimension_numbers = #tpu.dot_dimension_numbers<[1], [1], [0], [0], [0, 0, 1, 0], [], []>} : vector<8x8xbf16>, vector<8x8xbf16>, vector<8x8xf32> -> vector<8x8xf32>
    %cst_12 = arith.constant 0.353553385 : f32
    %19 = vector.broadcast %cst_12 : f32 to vector<8x8xf32>
    %20 = arith.mulf %18, %19 : vector<8x8xf32>
    %21 = arith.addf %20, %11 : vector<8x8xf32>
    %c0_13 = arith.constant 0 : index
    %c0_14 = arith.constant 0 : index
    %22 = vector.load %arg17[%c0_13, %c0_14] : memref<8x4xf32, #tpu.memory_space<vmem>>, vector<8x1xf32>
    %cst_15 = arith.constant dense<0xFF800000> : vector<8xf32>
    %23 = vector.multi_reduction <maximumf>, %21, %cst_15 [1] : vector<8x8xf32> to vector<8xf32>
    %24 = vector.shape_cast %23 : vector<8xf32> to vector<8x1xf32>
    %25 = arith.maximumf %22, %24 : vector<8x1xf32>
    %26 = arith.subf %22, %25 : vector<8x1xf32>
    %27 = math.exp %26 : vector<8x1xf32>
    %28 = vector.broadcast %25 : vector<8x1xf32> to vector<8x8xf32>
    %29 = arith.subf %21, %28 : vector<8x8xf32>
    %30 = math.exp %29 : vector<8x8xf32>
    %c0_16 = arith.constant 0 : index
    %c0_17 = arith.constant 0 : index
    %31 = vector.load %arg18[%c0_16, %c0_17] : memref<8x4xf32, #tpu.memory_space<vmem>>, vector<8x1xf32>
    %32 = arith.mulf %27, %31 : vector<8x1xf32>
    %cst_18 = arith.constant dense<0.000000e+00> : vector<8xf32>
    %33 = vector.multi_reduction <add>, %30, %cst_18 [1] : vector<8x8xf32> to vector<8xf32>
    %34 = vector.shape_cast %33 : vector<8xf32> to vector<8x1xf32>
    %35 = arith.addf %32, %34 : vector<8x1xf32>
    %c0_19 = arith.constant 0 : index
    %c0_20 = arith.constant 0 : index
    %36 = vector.load %arg18[%c0_19, %c0_20] : memref<8x4xf32, #tpu.memory_space<vmem>>, vector<8x1xf32>
    tpu.vector_store %arg18[%c0_19, %c0_20], %35 {strides = array<i32>} : memref<8x4xf32, #tpu.memory_space<vmem>>, vector<8x1xf32>,
    %c0_21 = arith.constant 0 : index
    %c0_22 = arith.constant 0 : index
    %37 = vector.load %arg16[%c0_21, %c0_22] : memref<8x32xf32, #tpu.memory_space<vmem>>, vector<8x8xf32>
    %38 = vector.broadcast %27 : vector<8x1xf32> to vector<8x8xf32>
    %39 = arith.mulf %38, %37 : vector<8x8xf32>
    %40 = arith.truncf %30 : vector<8x8xf32> to vector<8x8xbf16>
    %cst_23 = arith.constant dense<0.000000e+00> : vector<8x8xf32>
    %41 = tpu.matmul %40, %17, %cst_23 {dimension_numbers = #tpu.dot_dimension_numbers<[1], [0], [0], [1], [0, 0, 1, 1], [], []>} : vector<8x8xbf16>, vector<8x8xbf16>, vector<8x8xf32> -> vector<8x8xf32>
    %42 = arith.addf %39, %41 : vector<8x8xf32>
    %c0_24 = arith.constant 0 : index
    %c0_25 = arith.constant 0 : index
    %43 = vector.load %arg16[%c0_24, %c0_25] : memref<8x32xf32, #tpu.memory_space<vmem>>, vector<8x8xf32>
    tpu.vector_store %arg16[%c0_24, %c0_25], %42 {strides = array<i32>} : memref<8x32xf32, #tpu.memory_space<vmem>>, vector<8x8xf32>,
    %c0_26 = arith.constant 0 : index
    %c0_27 = arith.constant 0 : index
    %44 = vector.load %arg17[%c0_26, %c0_27] : memref<8x4xf32, #tpu.memory_space<vmem>>, vector<8x1xf32>
    tpu.vector_store %arg17[%c0_26, %c0_27], %25 {strides = array<i32>} : memref<8x4xf32, #tpu.memory_space<vmem>>, vector<8x1xf32>,
    %c0_28 = arith.constant 0 : index
    %c8 = arith.constant 8 : index
    %45 = vector.load %arg15[%c0_28, %c8] : memref<8x32xf32, #tpu.memory_space<vmem>>, vector<8x8xf32>
    %46 = arith.truncf %45 : vector<8x8xf32> to vector<8x8xbf16>
    %47 = vector.extract_strided_slice %10 {offsets = [0, 8], sizes = [8, 8], strides = [1, 1]} : vector<8x64xf32> to vector<8x8xf32>
    %48 = arith.truncf %47 : vector<8x8xf32> to vector<8x8xbf16>
    %49 = vector.extract_strided_slice %10 {offsets = [0, 40], sizes = [8, 8], strides = [1, 1]} : vector<8x64xf32> to vector<8x8xf32>
    %50 = arith.truncf %49 : vector<8x8xf32> to vector<8x8xbf16>
    %cst_29 = arith.constant dense<0.000000e+00> : vector<8x8xf32>
    %51 = tpu.matmul %46, %48, %cst_29 {dimension_numbers = #tpu.dot_dimension_numbers<[1], [1], [0], [0], [0, 0, 1, 0], [], []>} : vector<8x8xbf16>, vector<8x8xbf16>, vector<8x8xf32> -> vector<8x8xf32>
    %cst_30 = arith.constant 0.353553385 : f32
    %52 = vector.broadcast %cst_30 : f32 to vector<8x8xf32>
    %53 = arith.mulf %51, %52 : vector<8x8xf32>
    %54 = arith.addf %53, %11 : vector<8x8xf32>
    %c0_31 = arith.constant 0 : index
    %c1 = arith.constant 1 : index
    %55 = vector.load %arg17[%c0_31, %c1] : memref<8x4xf32, #tpu.memory_space<vmem>>, vector<8x1xf32>
    %cst_32 = arith.constant dense<0xFF800000> : vector<8xf32>
    %56 = vector.multi_reduction <maximumf>, %54, %cst_32 [1] : vector<8x8xf32> to vector<8xf32>
    %57 = vector.shape_cast %56 : vector<8xf32> to vector<8x1xf32>
    %58 = arith.maximumf %55, %57 : vector<8x1xf32>
    %59 = arith.subf %55, %58 : vector<8x1xf32>
    %60 = math.exp %59 : vector<8x1xf32>
    %61 = vector.broadcast %58 : vector<8x1xf32> to vector<8x8xf32>
    %62 = arith.subf %54, %61 : vector<8x8xf32>
    %63 = math.exp %62 : vector<8x8xf32>
    %c0_33 = arith.constant 0 : index
    %c1_34 = arith.constant 1 : index
    %64 = vector.load %arg18[%c0_33, %c1_34] : memref<8x4xf32, #tpu.memory_space<vmem>>, vector<8x1xf32>
    %65 = arith.mulf %60, %64 : vector<8x1xf32>
    %cst_35 = arith.constant dense<0.000000e+00> : vector<8xf32>
    %66 = vector.multi_reduction <add>, %63, %cst_35 [1] : vector<8x8xf32> to vector<8xf32>
    %67 = vector.shape_cast %66 : vector<8xf32> to vector<8x1xf32>
    %68 = arith.addf %65, %67 : vector<8x1xf32>
    %c0_36 = arith.constant 0 : index
    %c1_37 = arith.constant 1 : index
    %69 = vector.load %arg18[%c0_36, %c1_37] : memref<8x4xf32, #tpu.memory_space<vmem>>, vector<8x1xf32>
    tpu.vector_store %arg18[%c0_36, %c1_37], %68 {strides = array<i32>} : memref<8x4xf32, #tpu.memory_space<vmem>>, vector<8x1xf32>,
    %c0_38 = arith.constant 0 : index
    %c8_39 = arith.constant 8 : index
    %70 = vector.load %arg16[%c0_38, %c8_39] : memref<8x32xf32, #tpu.memory_space<vmem>>, vector<8x8xf32>
    %71 = vector.broadcast %60 : vector<8x1xf32> to vector<8x8xf32>
    %72 = arith.mulf %71, %70 : vector<8x8xf32>
    %73 = arith.truncf %63 : vector<8x8xf32> to vector<8x8xbf16>
    %cst_40 = arith.constant dense<0.000000e+00> : vector<8x8xf32>
    %74 = tpu.matmul %73, %50, %cst_40 {dimension_numbers = #tpu.dot_dimension_numbers<[1], [0], [0], [1], [0, 0, 1, 1], [], []>} : vector<8x8xbf16>, vector<8x8xbf16>, vector<8x8xf32> -> vector<8x8xf32>
    %75 = arith.addf %72, %74 : vector<8x8xf32>
    %c0_41 = arith.constant 0 : index
    %c8_42 = arith.constant 8 : index
    %76 = vector.load %arg16[%c0_41, %c8_42] : memref<8x32xf32, #tpu.memory_space<vmem>>, vector<8x8xf32>
    tpu.vector_store %arg16[%c0_41, %c8_42], %75 {strides = array<i32>} : memref<8x32xf32, #tpu.memory_space<vmem>>, vector<8x8xf32>,
    %c0_43 = arith.constant 0 : index
    %c1_44 = arith.constant 1 : index
    %77 = vector.load %arg17[%c0_43, %c1_44] : memref<8x4xf32, #tpu.memory_space<vmem>>, vector<8x1xf32>
    tpu.vector_store %arg17[%c0_43, %c1_44], %58 {strides = array<i32>} : memref<8x4xf32, #tpu.memory_space<vmem>>, vector<8x1xf32>,
    %c0_45 = arith.constant 0 : index
    %c16 = arith.constant 16 : index
    %78 = vector.load %arg15[%c0_45, %c16] : memref<8x32xf32, #tpu.memory_space<vmem>>, vector<8x8xf32>
    %79 = arith.truncf %78 : vector<8x8xf32> to vector<8x8xbf16>
    %80 = vector.extract_strided_slice %10 {offsets = [0, 16], sizes = [8, 8], strides = [1, 1]} : vector<8x64xf32> to vector<8x8xf32>
    %81 = arith.truncf %80 : vector<8x8xf32> to vector<8x8xbf16>
    %82 = vector.extract_strided_slice %10 {offsets = [0, 48], sizes = [8, 8], strides = [1, 1]} : vector<8x64xf32> to vector<8x8xf32>
    %83 = arith.truncf %82 : vector<8x8xf32> to vector<8x8xbf16>
    %cst_46 = arith.constant dense<0.000000e+00> : vector<8x8xf32>
    %84 = tpu.matmul %79, %81, %cst_46 {dimension_numbers = #tpu.dot_dimension_numbers<[1], [1], [0], [0], [0, 0, 1, 0], [], []>} : vector<8x8xbf16>, vector<8x8xbf16>, vector<8x8xf32> -> vector<8x8xf32>
    %cst_47 = arith.constant 0.353553385 : f32
    %85 = vector.broadcast %cst_47 : f32 to vector<8x8xf32>
    %86 = arith.mulf %84, %85 : vector<8x8xf32>
    %87 = arith.addf %86, %11 : vector<8x8xf32>
    %c0_48 = arith.constant 0 : index
    %c2 = arith.constant 2 : index
    %88 = vector.load %arg17[%c0_48, %c2] : memref<8x4xf32, #tpu.memory_space<vmem>>, vector<8x1xf32>
    %cst_49 = arith.constant dense<0xFF800000> : vector<8xf32>
    %89 = vector.multi_reduction <maximumf>, %87, %cst_49 [1] : vector<8x8xf32> to vector<8xf32>
    %90 = vector.shape_cast %89 : vector<8xf32> to vector<8x1xf32>
    %91 = arith.maximumf %88, %90 : vector<8x1xf32>
    %92 = arith.subf %88, %91 : vector<8x1xf32>
    %93 = math.exp %92 : vector<8x1xf32>
    %94 = vector.broadcast %91 : vector<8x1xf32> to vector<8x8xf32>
    %95 = arith.subf %87, %94 : vector<8x8xf32>
    %96 = math.exp %95 : vector<8x8xf32>
    %c0_50 = arith.constant 0 : index
    %c2_51 = arith.constant 2 : index
    %97 = vector.load %arg18[%c0_50, %c2_51] : memref<8x4xf32, #tpu.memory_space<vmem>>, vector<8x1xf32>
    %98 = arith.mulf %93, %97 : vector<8x1xf32>
    %cst_52 = arith.constant dense<0.000000e+00> : vector<8xf32>
    %99 = vector.multi_reduction <add>, %96, %cst_52 [1] : vector<8x8xf32> to vector<8xf32>
    %100 = vector.shape_cast %99 : vector<8xf32> to vector<8x1xf32>
    %101 = arith.addf %98, %100 : vector<8x1xf32>
    %c0_53 = arith.constant 0 : index
    %c2_54 = arith.constant 2 : index
    %102 = vector.load %arg18[%c0_53, %c2_54] : memref<8x4xf32, #tpu.memory_space<vmem>>, vector<8x1xf32>
    tpu.vector_store %arg18[%c0_53, %c2_54], %101 {strides = array<i32>} : memref<8x4xf32, #tpu.memory_space<vmem>>, vector<8x1xf32>,
    %c0_55 = arith.constant 0 : index
    %c16_56 = arith.constant 16 : index
    %103 = vector.load %arg16[%c0_55, %c16_56] : memref<8x32xf32, #tpu.memory_space<vmem>>, vector<8x8xf32>
    %104 = vector.broadcast %93 : vector<8x1xf32> to vector<8x8xf32>
    %105 = arith.mulf %104, %103 : vector<8x8xf32>
    %106 = arith.truncf %96 : vector<8x8xf32> to vector<8x8xbf16>
    %cst_57 = arith.constant dense<0.000000e+00> : vector<8x8xf32>
    %107 = tpu.matmul %106, %83, %cst_57 {dimension_numbers = #tpu.dot_dimension_numbers<[1], [0], [0], [1], [0, 0, 1, 1], [], []>} : vector<8x8xbf16>, vector<8x8xbf16>, vector<8x8xf32> -> vector<8x8xf32>
    %108 = arith.addf %105, %107 : vector<8x8xf32>
    %c0_58 = arith.constant 0 : index
    %c16_59 = arith.constant 16 : index
    %109 = vector.load %arg16[%c0_58, %c16_59] : memref<8x32xf32, #tpu.memory_space<vmem>>, vector<8x8xf32>
    tpu.vector_store %arg16[%c0_58, %c16_59], %108 {strides = array<i32>} : memref<8x32xf32, #tpu.memory_space<vmem>>, vector<8x8xf32>,
    %c0_60 = arith.constant 0 : index
    %c2_61 = arith.constant 2 : index
    %110 = vector.load %arg17[%c0_60, %c2_61] : memref<8x4xf32, #tpu.memory_space<vmem>>, vector<8x1xf32>
    tpu.vector_store %arg17[%c0_60, %c2_61], %91 {strides = array<i32>} : memref<8x4xf32, #tpu.memory_space<vmem>>, vector<8x1xf32>,
    %c0_62 = arith.constant 0 : index
    %c24 = arith.constant 24 : index
    %111 = vector.load %arg15[%c0_62, %c24] : memref<8x32xf32, #tpu.memory_space<vmem>>, vector<8x8xf32>
    %112 = arith.truncf %111 : vector<8x8xf32> to vector<8x8xbf16>
    %113 = vector.extract_strided_slice %10 {offsets = [0, 24], sizes = [8, 8], strides = [1, 1]} : vector<8x64xf32> to vector<8x8xf32>
    %114 = arith.truncf %113 : vector<8x8xf32> to vector<8x8xbf16>
    %115 = vector.extract_strided_slice %10 {offsets = [0, 56], sizes = [8, 8], strides = [1, 1]} : vector<8x64xf32> to vector<8x8xf32>
    %116 = arith.truncf %115 : vector<8x8xf32> to vector<8x8xbf16>
    %cst_63 = arith.constant dense<0.000000e+00> : vector<8x8xf32>
    %117 = tpu.matmul %112, %114, %cst_63 {dimension_numbers = #tpu.dot_dimension_numbers<[1], [1], [0], [0], [0, 0, 1, 0], [], []>} : vector<8x8xbf16>, vector<8x8xbf16>, vector<8x8xf32> -> vector<8x8xf32>
    %cst_64 = arith.constant 0.353553385 : f32
    %118 = vector.broadcast %cst_64 : f32 to vector<8x8xf32>
    %119 = arith.mulf %117, %118 : vector<8x8xf32>
    %120 = arith.addf %119, %11 : vector<8x8xf32>
    %c0_65 = arith.constant 0 : index
    %c3 = arith.constant 3 : index
    %121 = vector.load %arg17[%c0_65, %c3] : memref<8x4xf32, #tpu.memory_space<vmem>>, vector<8x1xf32>
    %cst_66 = arith.constant dense<0xFF800000> : vector<8xf32>
    %122 = vector.multi_reduction <maximumf>, %120, %cst_66 [1] : vector<8x8xf32> to vector<8xf32>
    %123 = vector.shape_cast %122 : vector<8xf32> to vector<8x1xf32>
    %124 = arith.maximumf %121, %123 : vector<8x1xf32>
    %125 = arith.subf %121, %124 : vector<8x1xf32>
    %126 = math.exp %125 : vector<8x1xf32>
    %127 = vector.broadcast %124 : vector<8x1xf32> to vector<8x8xf32>
    %128 = arith.subf %120, %127 : vector<8x8xf32>
    %129 = math.exp %128 : vector<8x8xf32>
    %c0_67 = arith.constant 0 : index
    %c3_68 = arith.constant 3 : index
    %130 = vector.load %arg18[%c0_67, %c3_68] : memref<8x4xf32, #tpu.memory_space<vmem>>, vector<8x1xf32>
    %131 = arith.mulf %126, %130 : vector<8x1xf32>
    %cst_69 = arith.constant dense<0.000000e+00> : vector<8xf32>
    %132 = vector.multi_reduction <add>, %129, %cst_69 [1] : vector<8x8xf32> to vector<8xf32>
    %133 = vector.shape_cast %132 : vector<8xf32> to vector<8x1xf32>
    %134 = arith.addf %131, %133 : vector<8x1xf32>
    %c0_70 = arith.constant 0 : index
    %c3_71 = arith.constant 3 : index
    %135 = vector.load %arg18[%c0_70, %c3_71] : memref<8x4xf32, #tpu.memory_space<vmem>>, vector<8x1xf32>
    tpu.vector_store %arg18[%c0_70, %c3_71], %134 {strides = array<i32>} : memref<8x4xf32, #tpu.memory_space<vmem>>, vector<8x1xf32>,
    %c0_72 = arith.constant 0 : index
    %c24_73 = arith.constant 24 : index
    %136 = vector.load %arg16[%c0_72, %c24_73] : memref<8x32xf32, #tpu.memory_space<vmem>>, vector<8x8xf32>
    %137 = vector.broadcast %126 : vector<8x1xf32> to vector<8x8xf32>
    %138 = arith.mulf %137, %136 : vector<8x8xf32>
    %139 = arith.truncf %129 : vector<8x8xf32> to vector<8x8xbf16>
    %cst_74 = arith.constant dense<0.000000e+00> : vector<8x8xf32>
    %140 = tpu.matmul %139, %116, %cst_74 {dimension_numbers = #tpu.dot_dimension_numbers<[1], [0], [0], [1], [0, 0, 1, 1], [], []>} : vector<8x8xbf16>, vector<8x8xbf16>, vector<8x8xf32> -> vector<8x8xf32>
    %141 = arith.addf %138, %140 : vector<8x8xf32>
    %c0_75 = arith.constant 0 : index
    %c24_76 = arith.constant 24 : index
    %142 = vector.load %arg16[%c0_75, %c24_76] : memref<8x32xf32, #tpu.memory_space<vmem>>, vector<8x8xf32>
    tpu.vector_store %arg16[%c0_75, %c24_76], %141 {strides = array<i32>} : memref<8x32xf32, #tpu.memory_space<vmem>>, vector<8x8xf32>,
    %c0_77 = arith.constant 0 : index
    %c3_78 = arith.constant 3 : index
    %143 = vector.load %arg17[%c0_77, %c3_78] : memref<8x4xf32, #tpu.memory_space<vmem>>, vector<8x1xf32>
    tpu.vector_store %arg17[%c0_77, %c3_78], %124 {strides = array<i32>} : memref<8x4xf32, #tpu.memory_space<vmem>>, vector<8x1xf32>,
    %c0_i32_79 = arith.constant 0 : i32
    %144 = arith.cmpi eq, %arg2, %c0_i32_79 : i32
    %145 = arith.extui %144 : i1 to i32
    %c0_i32_80 = arith.constant 0 : i32
    %146 = arith.cmpi ne, %145, %c0_i32_80 : i32
    scf.if %146 {
      %c0_81 = arith.constant 0 : index
      %c0_82 = arith.constant 0 : index
      %147 = vector.load %arg16[%c0_81, %c0_82] : memref<8x32xf32, #tpu.memory_space<vmem>>, vector<8x8xf32>
      %c0_83 = arith.constant 0 : index
      %c0_84 = arith.constant 0 : index
      %148 = vector.load %arg18[%c0_83, %c0_84] : memref<8x4xf32, #tpu.memory_space<vmem>>, vector<8x1xf32>
      %149 = tpu.reciprocal %148 {approx = true} : vector<8x1xf32> -> vector<8x1xf32>
      %150 = vector.broadcast %149 : vector<8x1xf32> to vector<8x8xf32>
      %151 = arith.mulf %147, %150 : vector<8x8xf32>
      %c0_85 = arith.constant 0 : index
      %c0_86 = arith.constant 0 : index
      %152 = vector.load %arg16[%c0_85, %c0_86] : memref<8x32xf32, #tpu.memory_space<vmem>>, vector<8x8xf32>
      tpu.vector_store %arg16[%c0_85, %c0_86], %151 {strides = array<i32>} : memref<8x32xf32, #tpu.memory_space<vmem>>, vector<8x8xf32>,
      %c0_87 = arith.constant 0 : index
      %c8_88 = arith.constant 8 : index
      %153 = vector.load %arg16[%c0_87, %c8_88] : memref<8x32xf32, #tpu.memory_space<vmem>>, vector<8x8xf32>
      %c0_89 = arith.constant 0 : index
      %c1_90 = arith.constant 1 : index
      %154 = vector.load %arg18[%c0_89, %c1_90] : memref<8x4xf32, #tpu.memory_space<vmem>>, vector<8x1xf32>
      %155 = tpu.reciprocal %154 {approx = true} : vector<8x1xf32> -> vector<8x1xf32>
      %156 = vector.broadcast %155 : vector<8x1xf32> to vector<8x8xf32>
      %157 = arith.mulf %153, %156 : vector<8x8xf32>
      %c0_91 = arith.constant 0 : index
      %c8_92 = arith.constant 8 : index
      %158 = vector.load %arg16[%c0_91, %c8_92] : memref<8x32xf32, #tpu.memory_space<vmem>>, vector<8x8xf32>
      tpu.vector_store %arg16[%c0_91, %c8_92], %157 {strides = array<i32>} : memref<8x32xf32, #tpu.memory_space<vmem>>, vector<8x8xf32>,
      %c0_93 = arith.constant 0 : index
      %c16_94 = arith.constant 16 : index
      %159 = vector.load %arg16[%c0_93, %c16_94] : memref<8x32xf32, #tpu.memory_space<vmem>>, vector<8x8xf32>
      %c0_95 = arith.constant 0 : index
      %c2_96 = arith.constant 2 : index
      %160 = vector.load %arg18[%c0_95, %c2_96] : memref<8x4xf32, #tpu.memory_space<vmem>>, vector<8x1xf32>
      %161 = tpu.reciprocal %160 {approx = true} : vector<8x1xf32> -> vector<8x1xf32>
      %162 = vector.broadcast %161 : vector<8x1xf32> to vector<8x8xf32>
      %163 = arith.mulf %159, %162 : vector<8x8xf32>
      %c0_97 = arith.constant 0 : index
      %c16_98 = arith.constant 16 : index
      %164 = vector.load %arg16[%c0_97, %c16_98] : memref<8x32xf32, #tpu.memory_space<vmem>>, vector<8x8xf32>
      tpu.vector_store %arg16[%c0_97, %c16_98], %163 {strides = array<i32>} : memref<8x32xf32, #tpu.memory_space<vmem>>, vector<8x8xf32>,
      %c0_99 = arith.constant 0 : index
      %c24_100 = arith.constant 24 : index
      %165 = vector.load %arg16[%c0_99, %c24_100] : memref<8x32xf32, #tpu.memory_space<vmem>>, vector<8x8xf32>
      %c0_101 = arith.constant 0 : index
      %c3_102 = arith.constant 3 : index
      %166 = vector.load %arg18[%c0_101, %c3_102] : memref<8x4xf32, #tpu.memory_space<vmem>>, vector<8x1xf32>
      %167 = tpu.reciprocal %166 {approx = true} : vector<8x1xf32> -> vector<8x1xf32>
      %168 = vector.broadcast %167 : vector<8x1xf32> to vector<8x8xf32>
      %169 = arith.mulf %165, %168 : vector<8x8xf32>
      %c0_103 = arith.constant 0 : index
      %c24_104 = arith.constant 24 : index
      %170 = vector.load %arg16[%c0_103, %c24_104] : memref<8x32xf32, #tpu.memory_space<vmem>>, vector<8x8xf32>
      tpu.vector_store %arg16[%c0_103, %c24_104], %169 {strides = array<i32>} : memref<8x32xf32, #tpu.memory_space<vmem>>, vector<8x8xf32>,
      %c0_105 = arith.constant 0 : index
      %c0_106 = arith.constant 0 : index
      %171 = vector.load %arg16[%c0_105, %c0_106] : memref<8x32xf32, #tpu.memory_space<vmem>>, vector<8x32xf32>
      %172 = arith.truncf %171 : vector<8x32xf32> to vector<8x32xbf16>
      %c0_107 = arith.constant 0 : index
      %c0_108 = arith.constant 0 : index
      %173 = vector.load %arg10[%c0_107, %c0_108] : memref<32x32xbf16, #tpu.memory_space<vmem>>, vector<32x32xbf16>
      %cst_109 = arith.constant dense<0.000000e+00> : vector<8x32xf32>
      %174 = tpu.matmul %172, %173, %cst_109 {dimension_numbers = #tpu.dot_dimension_numbers<[1], [0], [0], [1], [0, 0, 1, 1], [], []>} : vector<8x32xbf16>, vector<32x32xbf16>, vector<8x32xf32> -> vector<8x32xf32>
      %c0_110 = arith.constant 0 : index
      %c0_111 = arith.constant 0 : index
      %175 = vector.load %arg11[%c0_110, %c0_111] : memref<1x32xf32, #tpu.memory_space<vmem>>, vector<1x32xf32>
      %176 = vector.broadcast %175 : vector<1x32xf32> to vector<8x32xf32>
      %177 = arith.addf %174, %176 : vector<8x32xf32>
      %c0_112 = arith.constant 0 : index
      %c0_113 = arith.constant 0 : index
      %c0_114 = arith.constant 0 : index
      %178 = vector.load %arg3[%c0_112, %c0_113, %c0_114] : memref<1x8x32xf32, #tpu.memory_space<vmem>>, vector<1x8x32xf32>
      %179 = vector.shape_cast %178 : vector<1x8x32xf32> to vector<8x32xf32>
      %180 = arith.addf %179, %177 : vector<8x32xf32>
      %c0_115 = arith.constant 0 : index
      %c0_116 = arith.constant 0 : index
      %181 = vector.load %arg12[%c0_115, %c0_116] : memref<1x32xf32, #tpu.memory_space<vmem>>, vector<1x32xf32>
      %c0_117 = arith.constant 0 : index
      %c0_118 = arith.constant 0 : index
      %182 = vector.load %arg13[%c0_117, %c0_118] : memref<1x32xf32, #tpu.memory_space<vmem>>, vector<1x32xf32>
      %cst_119 = arith.constant dense<0.000000e+00> : vector<8xf32>
      %183 = vector.multi_reduction <add>, %180, %cst_119 [1] : vector<8x32xf32> to vector<8xf32>
      %184 = vector.shape_cast %183 : vector<8xf32> to vector<8x1xf32>
      %cst_120 = arith.constant 3.200000e+01 : f32
      %185 = vector.broadcast %cst_120 : f32 to vector<8x1xf32>
      %186 = arith.divf %184, %185 : vector<8x1xf32>
      %187 = vector.broadcast %186 : vector<8x1xf32> to vector<8x32xf32>
      %188 = arith.subf %180, %187 : vector<8x32xf32>
      %189 = arith.mulf %188, %188 : vector<8x32xf32>
      %cst_121 = arith.constant dense<0.000000e+00> : vector<8xf32>
      %190 = vector.multi_reduction <add>, %189, %cst_121 [1] : vector<8x32xf32> to vector<8xf32>
      %191 = vector.shape_cast %190 : vector<8xf32> to vector<8x1xf32>
      %cst_122 = arith.constant 3.200000e+01 : f32
      %192 = vector.broadcast %cst_122 : f32 to vector<8x1xf32>
      %193 = arith.divf %191, %192 : vector<8x1xf32>
      %194 = vector.broadcast %186 : vector<8x1xf32> to vector<8x32xf32>
      %195 = arith.subf %180, %194 : vector<8x32xf32>
      %cst_123 = arith.constant 9.99999974E-6 : f32
      %196 = vector.broadcast %cst_123 : f32 to vector<8x1xf32>
      %197 = arith.addf %193, %196 : vector<8x1xf32>
      %198 = math.rsqrt %197 : vector<8x1xf32>
      %199 = vector.broadcast %198 : vector<8x1xf32> to vector<8x32xf32>
      %200 = arith.mulf %195, %199 : vector<8x32xf32>
      %201 = vector.broadcast %181 : vector<1x32xf32> to vector<8x32xf32>
      %202 = arith.mulf %200, %201 : vector<8x32xf32>
      %203 = vector.broadcast %182 : vector<1x32xf32> to vector<8x32xf32>
      %204 = arith.addf %202, %203 : vector<8x32xf32>
      %205 = arith.truncf %204 : vector<8x32xf32> to vector<8x32xbf16>
      %c0_124 = arith.constant 0 : index
      %c0_125 = arith.constant 0 : index
      %c0_126 = arith.constant 0 : index
      %206 = vector.load %arg14[%c0_124, %c0_125, %c0_126] : memref<1x8x32xbf16, #tpu.memory_space<vmem>>, vector<1x8x32xbf16>
      %207 = vector.shape_cast %206 : vector<1x8x32xbf16> to vector<8x32xbf16>
      %208 = vector.shape_cast %205 : vector<8x32xbf16> to vector<1x8x32xbf16>
      tpu.vector_store %arg14[%c0_124, %c0_125, %c0_126], %208 {strides = array<i32>} : memref<1x8x32xbf16, #tpu.memory_space<vmem>>, vector<1x8x32xbf16>,
    } else {
    }
    return
  }
  func.func @transform_0(%arg0: i32, %arg1: i32, %arg2: i32) -> (i32, i32, i32) {
    %c0_i32 = arith.constant 0 : i32
    %c0_i32_0 = arith.constant 0 : i32
    return %arg0, %arg1, %c0_i32 : i32, i32, i32
  }
  func.func @transform_1(%arg0: i32, %arg1: i32, %arg2: i32) -> (i32, i32, i32) {
    %c0_i32 = arith.constant 0 : i32
    %c0_i32_0 = arith.constant 0 : i32
    return %arg0, %arg2, %c0_i32 : i32, i32, i32
  }
  func.func @transform_2(%arg0: i32, %arg1: i32, %arg2: i32) -> (i32, i32) {
    %c0_i32 = arith.constant 0 : i32
    return %arg1, %arg2 : i32, i32
  }
  func.func @transform_3(%arg0: i32, %arg1: i32, %arg2: i32) -> (i32, i32) {
    %c0_i32 = arith.constant 0 : i32
    %c0_i32_0 = arith.constant 0 : i32
    %c0_i32_1 = arith.constant 0 : i32
    return %c0_i32, %c0_i32_0 : i32, i32
  }
  func.func @transform_4(%arg0: i32, %arg1: i32, %arg2: i32) -> (i32, i32) {
    %c0_i32 = arith.constant 0 : i32
    %c0_i32_0 = arith.constant 0 : i32
    %c0_i32_1 = arith.constant 0 : i32
    return %c0_i32, %c0_i32_0 : i32, i32
  }
  func.func @transform_5(%arg0: i32, %arg1: i32, %arg2: i32) -> (i32, i32) {
    %c0_i32 = arith.constant 0 : i32
    %c0_i32_0 = arith.constant 0 : i32
    %c0_i32_1 = arith.constant 0 : i32
    return %c0_i32, %c0_i32_0 : i32, i32
  }
  func.func @transform_6(%arg0: i32, %arg1: i32, %arg2: i32) -> (i32, i32) {
    %c0_i32 = arith.constant 0 : i32
    %c0_i32_0 = arith.constant 0 : i32
    %c0_i32_1 = arith.constant 0 : i32
    return %c0_i32, %c0_i32_0 : i32, i32
  }
  func.func @transform_7(%arg0: i32, %arg1: i32, %arg2: i32) -> (i32, i32) {
    %c0_i32 = arith.constant 0 : i32
    %c0_i32_0 = arith.constant 0 : i32
    %c0_i32_1 = arith.constant 0 : i32
    return %c0_i32, %c0_i32_0 : i32, i32
  }
  func.func @transform_8(%arg0: i32, %arg1: i32, %arg2: i32) -> (i32, i32) {
    %c0_i32 = arith.constant 0 : i32
    %c0_i32_0 = arith.constant 0 : i32
    %c0_i32_1 = arith.constant 0 : i32
    return %c0_i32, %c0_i32_0 : i32, i32
  }
  func.func @transform_9(%arg0: i32, %arg1: i32, %arg2: i32) -> (i32, i32) {
    %c0_i32 = arith.constant 0 : i32
    %c0_i32_0 = arith.constant 0 : i32
    %c0_i32_1 = arith.constant 0 : i32
    return %c0_i32, %c0_i32_0 : i32, i32
  }
  func.func @transform_10(%arg0: i32, %arg1: i32, %arg2: i32) -> (i32, i32) {
    %c0_i32 = arith.constant 0 : i32
    %c0_i32_0 = arith.constant 0 : i32
    %c0_i32_1 = arith.constant 0 : i32
    return %c0_i32, %c0_i32_0 : i32, i32
  }
  func.func @transform_11(%arg0: i32, %arg1: i32, %arg2: i32) -> (i32, i32, i32) {
    %c0_i32 = arith.constant 0 : i32
    %c0_i32_0 = arith.constant 0 : i32
    return %arg0, %arg1, %c0_i32 : i32, i32, i32
  }
}

</mosaic_0001>

<bundles_post_ra>
// kernel: tpu_custom_call.1
= control target key start
LH: loop header
LB: loop body
LE: loop exit
PB: predicated region body
PF: predicated region fallthrough
CT: control target
= control target key end

     0   :  { %s2611_s0 = inlined_call_operand.hbm [shape: f32[2,8,32], index: 0, kind: input, shape index: {}]   ;;  %s2612_s1 = inlined_call_operand.hbm [shape: f32[2,8,32], index: 1, kind: input, shape index: {}]   ;;  %s2613_s2 = inlined_call_operand.hbm [shape: f32[8,8], index: 2, kind: input, shape index: {}]   ;;  %s2614_s3 = inlined_call_operand.hbm [shape: bf16[32,32], index: 3, kind: input, shape index: {}]   ;;  %s2615_s4 = inlined_call_operand.vmem [shape: f32[1,32], index: 4, kind: input, shape index: {}]   ;;  %s2616_s5 = inlined_call_operand.hbm [shape: bf16[32,64], index: 5, kind: input, shape index: {}]   ;;  %s2617_s6 = inlined_call_operand.vmem [shape: f32[1,64], index: 6, kind: input, shape index: {}]   ;;  %s2618_s7 = inlined_call_operand.hbm [shape: bf16[32,32], index: 7, kind: input, shape index: {}]   ;;  %s2619_s8 = inlined_call_operand.vmem [shape: f32[1,32], index: 8, kind: input, shape index: {}]   ;;  %s2620_s9 = inlined_call_operand.vmem [shape: f32[1,32], index: 9, kind: input, shape index: {}]   ;;  %s2621_s10 = inlined_call_operand.vmem [shape: f32[1,32], index: 10, kind: input, shape index: {}]   ;;  %s2622_s11 = inlined_call_operand.hbm [shape: bf16[2,8,32], index: 11, kind: output, shape index: {}]  }
   0x1   :  { %2628 = sst [smem:[#allocation28_spill]] %s2611_s0 }
   0x2   :  { %2629 = sst [smem:[#allocation29_spill]] %s2613_s2 }
   0x3   :  { %2630 = sst [smem:[#allocation30_spill]] %s2614_s3 }
   0x4   :  { %2631 = sst [smem:[#allocation31_spill]] %s2616_s5 }
   0x5   :  { %2632 = sst [smem:[#allocation32_spill]] %s2618_s7 }
   0x6   :  { %16 = vsyncpa [#allocation7], 0 }
   0x7   :  { %18 = vsyncpa [#allocation7 + $0x1], 0 }
   0x8   :  { %19 = vsyncpa [#allocation10], 0 }
   0x9   :  { %21 = vsyncpa [#allocation10 + $0x1], 0 }
   0xa   :  { %22 = vsyncpa [#allocation13], 0 }
   0xb   :  { %23 = vsyncpa [#allocation16], 0 }
   0xc   :  { %24 = vsyncpa [#allocation8], 0 }
   0xd   :  { %26 = vsyncpa [#allocation8 + $0x1], 0  ;;  %s2206_s17 = smov 0   ;;  %s2208_s18 = smov 0  }
   0xe   :  { %s2210_s19 = smov 0   ;;  %s2212_s20 = smov 0  }
   0xf   :  { %s2214_s21 = smov 0   ;;  %s2216_s22 = smov 0  }
  0x10 LB: > { %2633 = sst [smem:[#allocation24_spill]] %s2098_s17  ;;  %s2237_s23 = sadd.s32 4294967295, %s2118_s22   ;;  %s2118_s22 = sphi %s2216_s22, %s32_s22   ;;  %s2114_s21 = sphi %s2214_s21, %s2661_s21   ;;  %s2110_s20 = sphi %s2212_s20, %s2660_s20   ;;  %s2106_s19 = sphi %s2210_s19, %s2664_s19   ;;  %s2102_s18 = sphi %s2208_s18, %s2663_s18   ;;  %s2098_s17 = sphi %s2206_s17, %s2662_s17  }
  0x11   : > { %2634 = sst [smem:[#allocation25_spill]] %s2114_s21  ;;  %p1558_p0 = scmp.ge.s32.totalorder %s2118_s22, 1 }
  0x12   : > { %p2623_p1 = scmp.eq.s32.totalorder %s2237_s23, 0  ;;  %p336_p2 = scmp.lt.s32.totalorder %s2118_s22, 3 }
  0x13   : > { %s2120_s25 = smov [#allocation11]   ;;  %s2121_s27 = smov [#allocation12]  }
  0x14   : > { %p2242_p3 = pnand %p1558_p0, %p336_p2  ;;  %s352_s26 = sshll.u32 %s2120_s25, 4  ;;  %s353_s26 = int_to_ptr.vmem [resolvable:$true] %s352_s26 }
  0x15   : > { %s362_s28 = sshll.u32 %s2121_s27, 4  ;;  %s2122_s30 = smov [#allocation14]   ;;  %s363_s28 = int_to_ptr.vmem [resolvable:$true] %s362_s28 }
  0x16   : > { %s2635_s24 = scalar_select %p2242_p3, 1, 0 }
  0x17   : > { %p1721_p5 = pneg %p2242_p3  ;;  %s378_s12 = sshll.u32 %s2122_s30, 4  ;;  %s379_s12 = int_to_ptr.vmem [resolvable:$true] %s378_s12 }
  0x18   : > { %s1873_s13 = scalar_lea.vmem %s353_s26, 128  ;;  %p1881_p11 = scmp.lt.s32.totalorder %s353_s26, %s353_s26 }
  0x19   : > { %p2251_p6 = pnand %p1721_p5, %p2623_p1  ;;  %p1874_p8 = scmp.ne.s32.totalorder %s353_s26, %s1873_s13 }
  0x1a   : > { %p1882_p12 = scmp.lt.s32.totalorder %s1873_s13, %s1873_s13 }
  0x1b   : > { %p1864_p7 = pneg %p2251_p6 }
  0x1c   : > { %p1883_p13 = por %p1882_p12, %p1881_p11 }
  0x1d   : > { %p1876_p9 = pnand %p1874_p8, %p1864_p7 }
  0x1f   : > { %p1877_p10 = pneg %p1876_p9 }
  0x21   : > { %p1884_p0 = pnand %p1883_p13, %p1877_p10 }
  0x23   : > { %1887 = shalt.err (!%p1884_p0)
}
  0x24   : > { %s2637_s2 = sld [smem:[#allocation29_spill]]  ;;  %s1899_s16 = scalar_lea.vmem %s363_s28, 256 }
  0x25   : > { %p1900_p2 = scmp.ne.s32.totalorder %s363_s28, %s1899_s16  ;;  %p1907_p8 = scmp.lt.s32.totalorder %s363_s28, %s363_s28 }
  0x26   : > { %p1908_p9 = scmp.lt.s32.totalorder %s1899_s16, %s1899_s16 }
  0x27   : > { %p1902_p5 = pnand %p1900_p2, %p1864_p7 }
  0x28   : > { %p1909_p1 = por %p1908_p9, %p1907_p8 }
  0x29   : > { %p1903_p4 = pneg %p1902_p5 }
  0x2a   : > { %1724 = dma.hbm_to_vmem [thread:$0]  (!%p2251_p6), %s2637_s2, 128, %s353_s26, [#allocation10]  }
  0x2b   : > { %p1910_p3 = pnand %p1909_p1, %p1903_p4 }
  0x2d   : > { %1913 = shalt.err (!%p1910_p3)
}
  0x2e   : > { %s2123_s25 = smov 64   ;;  %s2124_s27 = smov 4  }
  0x2f   : > { %s2638_s3 = sld [smem:[#allocation30_spill]]  ;;  %s1925_s26 = scalar_lea.vmem %s379_s12, 256 }
  0x30   : > { %p1926_p10 = scmp.ne.s32.totalorder %s379_s12, %s1925_s26  ;;  %p1933_p13 = scmp.lt.s32.totalorder %s379_s12, %s379_s12 }
  0x31   : > { %p1934_p0 = scmp.lt.s32.totalorder %s1925_s26, %s1925_s26 }
  0x32   : > { %p1928_p11 = pnand %p1926_p10, %p1864_p7 }
  0x33   : > { %p1935_p1 = por %p1934_p0, %p1933_p13 }
  0x34   : > { %p1929_p12 = pneg %p1928_p11 }
  0x35   : > { %1727 = dma.hbm_to_vmem [thread:$0]  (!%p2251_p6), %s2638_s3, 256, %s363_s28, [#allocation13], %s2123_s25, %s2123_s25, %s2124_s27  }
  0x36   : > { %p1936_p3 = pnand %p1935_p1, %p1929_p12 }
  0x38   : > { %1939 = shalt.err (!%p1936_p3)
}
  0x39   : > { %s2639_s5 = sld [smem:[#allocation31_spill]]  ;;  %s2125_s28 = smov [#allocation15]  }
  0x3a   : > { %s394_s16 = sshll.u32 %s2125_s28, 4  ;;  %s395_s16 = int_to_ptr.vmem [resolvable:$true] %s394_s16 }
  0x3b   : > { %s1951_s30 = scalar_lea.vmem %s395_s16, 256  ;;  %p1959_p8 = scmp.lt.s32.totalorder %s395_s16, %s395_s16 }
  0x3c   : > { %p1952_p4 = scmp.ne.s32.totalorder %s395_s16, %s1951_s30  ;;  %p1960_p9 = scmp.lt.s32.totalorder %s1951_s30, %s1951_s30 }
  0x3e   : > { %p1954_p2 = pnand %p1952_p4, %p1864_p7  ;;  %p1961_p10 = por %p1960_p9, %p1959_p8 }
  0x3f   : > { %1730 = dma.hbm_to_vmem [thread:$0]  (!%p2251_p6), %s2639_s5, 256, %s379_s12, [#allocation13], %s2123_s25, %s2123_s25, %s2124_s27  }
  0x40   : > { %p1955_p5 = pneg %p1954_p2 }
  0x42   : > { %p1962_p11 = pnand %p1961_p10, %p1955_p5 }
  0x44   : > { %1965 = shalt.err (!%p1962_p11)
}
  0x45   : > { %s2640_s7 = sld [smem:[#allocation32_spill]]  ;;  %s1557_s12 = sadd.s32 4294967294, %s2118_s22  }
  0x46   : > { %s51_s14 = sadd.s32 1, %s2114_s21  ;;  %s60_s29 = sadd.s32 1, %s2106_s19 }
  0x47   : > { %p53_p7 = scmp.ge.s32.totalorder %s51_s14, 2  ;;  %p67_p12 = scmp.ne.s32.totalorder %s2106_s19, %s2102_s18 }
  0x48   : > { %p68_p13 = scmp.eq.s32.totalorder %s2118_s22, 0  ;;  %p73_p1 = scmp.ne.s32.totalorder %s2102_s18, %s2098_s17 }
  0x49   : > { %s2666_s14 = smov (%p53_p7, %s51_s14), 0  ;;  %p2643_p4 = scmp.eq.s32.totalorder %s2237_s23, 0 }
  0x4a   : > { %2641 = sst [smem:[#allocation26_spill]] %s2666_s14  ;;  %p2297_p0 = por %p68_p13, %p67_p12 }
  0x4b   : > { %1733 = dma.hbm_to_vmem [thread:$0]  (!%p2251_p6), %s2640_s7, 256, %s395_s16, [#allocation16], %s2123_s25, %s2123_s25, %s2124_s27  }
  0x4c   : > { %s55_s25 = ssub.s32 %s2114_s21, %s2666_s14  ;;  %p323_p6 = scmp.eq.s32.totalorder %s2237_s23, 1 }
  0x4d   : > { %p58_p3 = scmp.eq.s32.totalorder %s55_s25, 0  ;;  %p2308_p2 = por %p2643_p4, %p73_p1 }
  0x4e   : > { %p2312_p5 = por %p323_p6, %p67_p12  ;;  %p329_p8 = scmp.eq.s32.totalorder %s1557_s12, 1 }
  0x4f   : > { %s2317_s16 = scalar_select %p58_p3, %s2106_s19, %s60_s29  }
  0x50   : > { %p2319_p9 = por %p329_p8, %p73_p1  ;;  %p1749_p10 = scmp.lt.s32.totalorder %s2118_s22, 2 }
  0x51   : > { %2646 = sst [smem:[#allocation27_spill]] %s2317_s16  ;;  %s417_s13 = sand.u32 1, %s2106_s19  }
  0x52   : > { %s1565_s26 = sshll.u32 %s2114_s21, 7  ;;  %s1564_s25 = sshll.u32 %s417_s13, 3 }
  0x53   : > { %s2648_s0 = sld [smem:[#allocation28_spill]]  ;;  %s421_s7 = scalar_lea.vmem [#allocation6], %s1564_s25 }
  0x54   : > { %s429_s14 = sshll.u32 %s421_s7, 4  ;;  %p2331_p11 = pnand %p1749_p10, %p2297_p0  ;;  %s430_s14 = int_to_ptr.vmem [resolvable:$true] %s429_s14 }
  0x55   : > { %s2338_s16 = scalar_lea.hbm %s2612_s1, %s1565_s26  ;;  %s418_s21 = scalar_lea.sflag [#allocation7], %s417_s13 }
  0x56   : > { %p1968_p7 = pneg %p2331_p11  ;;  %s1979_s2 = scalar_lea.vmem %s430_s14, 128 }
  0x57   : > { %p1980_p12 = scmp.ne.s32.totalorder %s430_s14, %s1979_s2  ;;  %s2126_s3 = smov [#allocation6]  }
  0x58   : > { %s1984_s7 = sshll.u32 %s2126_s3, 4  ;;  %s1985_s7 = int_to_ptr.vmem [resolvable:$false] %s1984_s7 }
  0x59   : > { %s427_s5 = scalar_lea.hbm %s2648_s0, %s1565_s26  ;;  %p1982_p13 = pnand %p1980_p12, %p1968_p7 }
  0x5a   : > { %s1986_s15 = scalar_lea.vmem %s1985_s7, 256  ;;  %p1987_p1 = scmp.lt.s32.totalorder %s430_s14, %s1985_s7 }
  0x5b   : > { %p1983_p0 = pneg %p1982_p13  ;;  %p1988_p6 = scmp.lt.s32.totalorder %s1986_s15, %s1979_s2 }
  0x5d   : > { %p1989_p3 = por %p1988_p6, %p1987_p1 }
  0x5f   : > { %p1990_p4 = pnand %p1989_p3, %p1983_p0 }
  0x61   : > { %1993 = shalt.err (!%p1990_p4)
}
  0x62   : > { %1737 = dma.hbm_to_vmem [thread:$0]  (!%p2331_p11), %s427_s5, 128, %s430_s14, %s418_s21  }
  0x63   : > { %s436_s13 = sand.u32 1, %s2118_s22   ;;  %s440_s26 = scalar_lea.vmem [#allocation9], %s1564_s25 }
  0x64   : > { %s448_s12 = sshll.u32 %s440_s26, 4  ;;  %s437_s29 = scalar_lea.sflag [#allocation10], %s436_s13  ;;  %s449_s12 = int_to_ptr.vmem [resolvable:$true] %s448_s12 }
  0x65   : > { %s2007_s0 = scalar_lea.vmem %s449_s12, 128  ;;  %s2127_s2 = smov [#allocation9]  }
  0x66   : > { %p2008_p8 = scmp.ne.s32.totalorder %s449_s12, %s2007_s0  ;;  %s2012_s3 = sshll.u32 %s2127_s2, 4  ;;  %s2013_s3 = int_to_ptr.vmem [resolvable:$false] %s2012_s3 }
  0x67   : > { %s2014_s7 = scalar_lea.vmem %s2013_s3, 256  ;;  %p2015_p13 = scmp.lt.s32.totalorder %s449_s12, %s2013_s3 }
  0x68   : > { %p2010_p10 = pnand %p2008_p8, %p1968_p7  ;;  %p2016_p0 = scmp.lt.s32.totalorder %s2014_s7, %s2007_s0 }
  0x6a   : > { %p2011_p12 = pneg %p2010_p10  ;;  %p2017_p1 = por %p2016_p0, %p2015_p13 }
  0x6c   : > { %p2018_p6 = pnand %p2017_p1, %p2011_p12 }
  0x6e   : > { %2021 = shalt.err (!%p2018_p6)
}
  0x6f   : > { %1740 = dma.hbm_to_vmem [thread:$0]  (!%p2331_p11), %s2338_s16, 128, %s449_s12, %s437_s29  }
  0x70   : > { %p2650_p3 = scmp.ne.s32.totalorder %s2635_s24, 0 }
  0x71   : > { %s2357_s5 = sand.u32 (!%p2650_p3), 1, %s2102_s18  }
  0x72   : > { %457 = sbr.rel (%p2650_p3) target bundleno = 1858 (0x742), region = 64  ;;  %s1569_s21 = sshll.u32 (!%p2650_p3), %s2357_s5, 3 }
  0x73   : > { %s460_s14 = scalar_lea.sflag (!%p2650_p3), [#allocation7], %s2357_s5  ;;  %s463_s25 = scalar_lea.vmem (!%p2650_p3), [#allocation6], %s1569_s21 }
  0x77   : > { %2073 = dma.done.wait (%p2308_p2), %s460_s14, 128  }
  0x78   : > { %2075 = vsyncadd (%p2308_p2), %s460_s14, 4294967168  ;;  %s468_s0 = sand.u32 1, %s2237_s23   ;;  %s472_s24 = scalar_lea.vmem [#allocation9], %s1569_s21 }
  0x79   : > { %s469_s17 = scalar_lea.sflag [#allocation10], %s468_s0 }
  0x7a   : > { %2077 = dma.done.wait (%p2308_p2), %s469_s17, 128  }
  0x7b   : > { %2079 = vsyncadd (%p2308_p2), %s469_s17, 4294967168  ;;  %p2651_p11 = scmp.eq.s32.totalorder %s2237_s23, 0 }
  0x7d   : > { %2081 = dma.done.wait (%p2651_p11), [#allocation10], 128   ;;  %p2652_p7 = pmov %p2651_p11 }
  0x7f   : > { %2083 = vsyncadd (%p2652_p7), [#allocation10], 4294967168  ;;  %p2653_p4 = pmov %p2652_p7 }
  0x81   : > { %2085 = dma.done.wait (%p2653_p4), [#allocation13], 512   ;;  %p2654_p8 = pmov %p2653_p4 }
  0x82   : > { %p2655_p10 = pmov %p2653_p4 }
  0x83   : > { %2087 = vsyncadd (%p2654_p8), [#allocation13], 4294966784 }
  0x84   : > { %2089 = dma.done.wait (%p2655_p10), [#allocation16], 256   ;;  %p2656_p12 = pmov %p2653_p4 }
  0x85   : > { %vm562_vm0 = vcmask 261120   ;;  %v2128_v0 = vmov 0.0   ;;  %vm2129_vm1 = vmmov 0   ;;  %v1836_v1 = vld [vmem:[#allocation12 + $0x8] sm:$0xff]   ;;  %v1837_v2 = vld [vmem:[#allocation14 + $0x8] sm:$0xff]   ;;  %v1838_v3 = vld [vmem:[#allocation12] sm:$0xff]  }
  0x86   : > { %2091 = vsyncadd (%p2656_p12), [#allocation16], 4294967040  ;;  %1627 = vmatprep.subr.bf16.mxu0 %v2128_v0  ;;  %1635 = vmatprep.subr.bf16.mxu1 %v2128_v0  ;;  %607 = vst.msk [vmem:[#allocation3] sm:$0xff] %vm562_vm0, %v2128_v0  ;;  %v1839_v4 = vld [vmem:[#allocation14] sm:$0xff]   ;;  %v2392_v5 = vld [vmem:[%s463_s25] sm:$0xff]  ;;  %vm684_vm2 = vcmask 64512  }
  0x87   : > { %1631 = vmatprep.mubr.msk.bf16.mxu0 %vm2129_vm1, %v2128_v0  ;;  %1639 = vmatprep.mubr.msk.bf16.mxu1 %vm2129_vm1, %v2128_v0  ;;  %v611_v6 = vld [vmem:[%s472_s24] sm:$0xff]  ;;  %v538_v7 = vpack.c.bf16 %v2392_v5, %v2392_v5  ;;  %v1576_v9 = vld [vmem:[%s2615_s4] ss:$0 sm:$0xff]  ;;  %s2130_s13 = smov 112   ;;  %s2131_s26 = smov 120   ;;  %vm608_vm3 = vcmask 31744  }
  0x88   : > { %1628 = vmatpush3.bf16.msra.mxu0 %v1836_v1  ;;  %1636 = vmatpush3.bf16.msra.mxu1 %v1837_v2  ;;  %v612_v8 = vpack.c.bf16 %v611_v6, %v611_v6  ;;  %v1580_v10 = vld [vmem:[%s2617_s6] ss:$0 sm:$0xff]  ;;  %s2132_s12 = smov 104   ;;  %v2133_v42 = vmov -inf   ;;  %610 = vst.msk [vmem:[#allocation5] sm:$0xff] %vm608_vm3, %v2128_v0  ;;  %v2134_v43 = vmov 0  }
  0x89   : > { %1629 = vmatprep.subr.bf16.mxu0 %v2128_v0  ;;  %1637 = vmatprep.subr.bf16.mxu1 %v2128_v0  ;;  %v680_v35 = vld [vmem:[#allocation11] sm:$0xff]  ;;  %609 = vst.msk [vmem:[#allocation4] sm:$0xff] %vm608_vm3, %v2133_v42  ;;  %v2135_v60 = vmov 1   ;;  %vm755_vm4 = vcmask 7168   ;;  %vm895_vm5 = vcmask 15368   ;;  %vm1038_vm6 = vcmask 23568  }
  0x8a   : > { %1826 = vset.pattern.permute.xlu1 %v2134_v43  ;;  %1827 = vset.pattern.permute.xlu0 %v2135_v60  ;;  %s2137_s29 = smov 96   ;;  %vm1181_vm7 = vcmask 31768   ;;  %s2139_s2 = smov 88   ;;  %vm771_vm8 = vcmask 1043456   ;;  %vm958_vm9 = vcmask 130112   ;;  %vm1101_vm10 = vcmask 195712  }
  0x8b   : > { %s2140_s3 = smov 80   ;;  %s2141_s7 = smov 72   ;;  %vm1244_vm11 = vcmask 261312   ;;  %vm1391_vm12 = vcmask 257024  }
  0x8c   : > { %1630 = vmatpush3.bf16.msra.mxu0 %v1838_v3  ;;  %1638 = vmatpush3.bf16.msra.mxu1 %v1839_v4  ;;  %s2142_s21 = smov 8   ;;  %s2143_s14 = smov 16  }
  0x8d   : > { %1643 = vmatprep.subr.bf16.mxu0 %v2128_v0  ;;  %1649 = vmatprep.subr.bf16.mxu1 %v2128_v0  ;;  %s2144_s25 = smov 24   ;;  %s1575_s24 = sshll.u32 %s2357_s5, 2 }
  0x8f   : > { %1632 = vmatmul.mubr.msk.bf16.vlgmr.msra.gmra.mxu0 %vm562_vm0, %v538_v7  ;;  %1640 = vmatmul.mubr.msk.bf16.vlgmr.msra.gmra.mxu1 %vm562_vm0, %v612_v8  ;;  %v2136_v8 = vmov 2  }
  0x90   : > { %1645 = vmatprep.mubr.msk.bf16.mxu0 %vm2129_vm1, %v2128_v0  ;;  %1651 = vmatprep.mubr.msk.bf16.mxu1 %vm2129_vm1, %v2128_v0  ;;  %v2455_v3 = vld [vmem:[#allocation4] sm:$0xff] }
 0x14f   : > { %v600_v11 = vpop.f32.mrf.mxu0  ;;  %v674_v13 = vpop.f32.mrf.mxu1 }
 0x150   : > { %v601_v12 = vadd.f32 %v1576_v9, %v600_v11  ;;  %v675_v14 = vadd.f32 %v1580_v10, %v674_v13 }
 0x151   : > { %v1633_v15 = vpop.f32.mrf.mxu0  ;;  %v1641_v16 = vpop.f32.mrf.mxu1 }
 0x152   : > { %606 = vst.msk [vmem:[#allocation2] sm:$0xff] %vm562_vm0, %v601_v12  ;;  %v2411_v17 = vpack.c.bf16 %v675_v14, %v675_v14 }
 0x153   : > { %v603_v18 = vpop.f32.mrf.mxu0  ;;  %v677_v19 = vpop.f32.mrf.mxu1 }
 0x154   : > { %966 = vrot.lane.b32.xlu1 %v2411_v17, %s2130_s13  ;;  %823 = vrot.lane.b32.xlu0 %v2411_v17, %s2131_s26  ;;  %v689_v21 = vsel %vm684_vm2, %v2411_v17, 0  ;;  %v2138_v18 = vmov 3  }
 0x155   : > { %v1634_v20 = vpop.f32.mrf.mxu0  ;;  %v1642_v22 = vpop.f32.mrf.mxu1  ;;  %1644 = vmatpush3.bf16.xpose.msra.mxu0 %v689_v21 }
 0x156   : > { %1655 = vmatprep.subr.bf16.mxu0 %v2128_v0 }
 0x159   : > { %v961_v23 = vld [vmem:[#allocation2] sm:$0xff] }
 0x15a   : > { %v962_v24 = vpack.c.bf16 %v961_v23, %v961_v23 }
 0x15c   : > { %964 = vrot.lane.b32.xlu1 %v962_v24, %s2130_s13  ;;  %821 = vrot.lane.b32.xlu0 %v962_v24, %s2131_s26  ;;  %s1599_s13 = sshll.u32 %s2110_s20, 6  ;;  %s531_s26 = scalar_lea.vmem [#allocation17], %s1575_s24 }
 0x15d   : > { %1646 = vmatmul.mubr.msk.bf16.vlgmr.msra.gmra.mxu0 %vm684_vm2, %v962_v24 }
 0x15e   : > { %1657 = vmatprep.mubr.msk.bf16.mxu0 %vm2129_vm1, %v2128_v0 }
 0x160   : > { %1107 = vrot.lane.b32.xlu1 %v962_v24, %s2132_s12  ;;  %1109 = vrot.lane.b32.xlu0 %v2411_v17, %s2132_s12  ;;  %s1408_s12 = sshll.u32 %s531_s26, 4  ;;  %s1409_s12 = int_to_ptr.vmem [resolvable:$true] %s1408_s12 }
 0x1c6   : > { %v824_v25 = vpop.permute.xlu0 %823  ;;  %v967_v27 = vpop.permute.xlu1 %966 }
 0x1c7   : > { %v829_v26 = vsel %vm684_vm2, %v824_v25, 0  ;;  %v972_v29 = vsel %vm684_vm2, %v967_v27, 0 }
 0x1c8   : > { %1656 = vmatpush3.bf16.xpose.msra.mxu0 %v829_v26 }
 0x1c9   : > { %1667 = vmatprep.subr.bf16.mxu0 %v2128_v0 }
 0x1ce   : > { %v822_v28 = vpop.permute.xlu0 %821  ;;  %v965_v31 = vpop.permute.xlu1 %964 }
 0x1cf   : > { %1658 = vmatmul.mubr.msk.bf16.vlgmr.msra.gmra.mxu0 %vm684_vm2, %v822_v28 }
 0x1d0   : > { %1668 = vmatpush3.bf16.xpose.msra.mxu0 %v972_v29  ;;  %1669 = vmatprep.mubr.msk.bf16.mxu0 %vm2129_vm1, %v2128_v0 }
 0x1d1   : > { %1679 = vmatprep.subr.bf16.mxu0 %v2128_v0 }
 0x1d2   : > { %v1110_v30 = vpop.permute.xlu0 %1109  ;;  %v1108_v33 = vpop.permute.xlu1 %1107 }
 0x1d3   : > { %v1115_v32 = vsel %vm684_vm2, %v1110_v30, 0 }
 0x1d7   : > { %1670 = vmatmul.mubr.msk.bf16.vlgmr.msra.gmra.mxu0 %vm684_vm2, %v965_v31 }
 0x1d8   : > { %1680 = vmatpush3.bf16.xpose.msra.mxu0 %v1115_v32  ;;  %1681 = vmatprep.mubr.msk.bf16.mxu0 %vm2129_vm1, %v2128_v0 }
 0x1d9   : > { %1691 = vmatprep.subr.bf16.mxu0 %v2128_v0 }
 0x1df   : > { %1682 = vmatmul.mubr.msk.bf16.vlgmr.msra.gmra.mxu0 %vm684_vm2, %v1108_v33 }
 0x1e0   : > { %1695 = vmatprep.mubr.msk.bf16.mxu0 %vm2129_vm1, %v2128_v0 }
 0x21d   : > { %v725_v34 = vpop.f32.mrf.mxu0 }
 0x21e   : > { %v731_v36 = vmul.f32 0.35355338, %v725_v34 }
 0x21f   : > { %v1647_v37 = vpop.f32.mrf.mxu0 }
 0x220   : > { %v2437_v38 = vadd.f32 %v731_v36, %v680_v35 }
 0x221   : > { %v728_v39 = vpop.f32.mrf.mxu0 }
 0x222   : > { %v734_v40 = vsel %vm684_vm2, %v2437_v38, -inf }
 0x223   : > { %735 = vmax.xlane.f32.xlu0 %v734_v40  ;;  %v1648_v41 = vpop.f32.mrf.mxu0 }
 0x28f   : > { %v865_v44 = vpop.f32.mrf.mxu0 }
 0x290   : > { %v871_v45 = vmul.f32 0.35355338, %v865_v44 }
 0x291   : > { %v1659_v46 = vpop.f32.mrf.mxu0 }
 0x292   : > { %v2443_v47 = vadd.f32 %v871_v45, %v680_v35 }
 0x293   : > { %v868_v48 = vpop.f32.mrf.mxu0 }
 0x294   : > { %v874_v49 = vsel %vm684_vm2, %v2443_v47, -inf }
 0x295   : > { %875 = vmax.xlane.f32.xlu1 %v874_v49  ;;  %v1660_v50 = vpop.f32.mrf.mxu0 }
 0x297   : > { %v1008_v51 = vpop.f32.mrf.mxu0 }
 0x298   : > { %v1014_v52 = vmul.f32 0.35355338, %v1008_v51 }
 0x299   : > { %v1671_v53 = vpop.f32.mrf.mxu0 }
 0x29a   : > { %v2447_v54 = vadd.f32 %v1014_v52, %v680_v35 }
 0x29b   : > { %v1011_v55 = vpop.f32.mrf.mxu0 }
 0x29c   : > { %v1017_v56 = vsel %vm684_vm2, %v2447_v54, -inf }
 0x29d   : > { %1018 = vmax.xlane.f32.xlu0 %v1017_v56  ;;  %v1672_v57 = vpop.f32.mrf.mxu0 }
 0x29f   : > { %v1151_v58 = vpop.f32.mrf.mxu0 }
 0x2a0   : > { %v1157_v59 = vmul.f32 0.35355338, %v1151_v58 }
 0x2a1   : > { %v1683_v61 = vpop.f32.mrf.mxu0 }
 0x2a2   : > { %v2451_v62 = vadd.f32 %v1157_v59, %v680_v35  ;;  %v749_v59 = vld [vmem:[#allocation5] sm:$0xff] }
 0x2a3   : > { %v1154_v63 = vpop.f32.mrf.mxu0 }
 0x2a4   : > { %v1160_v1 = vsel %vm684_vm2, %v2451_v62, -inf }
 0x2a5   : > { %1161 = vmax.xlane.f32.xlu0 %v1160_v1  ;;  %v1684_v2 = vpop.f32.mrf.mxu0 }
 0x2ac   : > { %v736_v4 = vpop.xlane.xlu0 %735 }
 0x2ad   : > { %v2458_v6 = vmax.f32 %v2455_v3, %v736_v4 }
 0x2af   : > { %v738_v7 = vsub.f32 %v2455_v3, %v2458_v6  ;;  %817 = vst.msk [vmem:[#allocation4] sm:$0xff] %vm755_vm4, %v2458_v6  ;;  %743 = vperm.xlu1 %1826, %v2458_v6  }
 0x2b1   : > { %v739_v48 = vmul.f32 1.442695, %v738_v7 }
 0x2b3   : > { %1828 = vset.pattern.permute.xlu1 %v2136_v8 }
 0x2b6   : > { %v2466_v9 = vld [vmem:[#allocation4] sm:$0xff] }
 0x31e   : > { %v876_v10 = vpop.xlane.xlu1 %875 }
 0x31f   : > { %v2469_v11 = vmax.f32 %v2466_v9, %v876_v10 }
 0x321   : > { %v878_v12 = vsub.f32 %v2466_v9, %v2469_v11  ;;  %960 = vst.msk [vmem:[#allocation4] sm:$0xff] %vm895_vm5, %v2469_v11  ;;  %883 = vperm.xlu0 %1827, %v2469_v11  }
 0x323   : > { %v879_v57 = vmul.f32 1.442695, %v878_v12 }
 0x326   : > { %v1019_v14 = vpop.xlane.xlu0 %1018 }
 0x328   : > { %v2476_v13 = vld [vmem:[#allocation4] sm:$0xff] }
 0x329   : > { %v2479_v15 = vmax.f32 %v2476_v13, %v1019_v14 }
 0x32a   : > { %v744_v23 = vpop.permute.xlu1 %743 }
 0x32b   : > { %v1021_v16 = vsub.f32 %v2476_v13, %v2479_v15  ;;  %1103 = vst.msk [vmem:[#allocation4] sm:$0xff] %vm1038_vm6, %v2479_v15  ;;  %1026 = vperm.xlu1 %1828, %v2479_v15   ;;  %v746_v24 = vsub.f32 %v2437_v38, %v744_v23  ;;  %v757_v23 = vld [vmem:[#allocation3] sm:$0xff] }
 0x32d   : > { %v747_v25 = vmul.f32 1.442695, %v746_v24  ;;  %v1022_v63 = vmul.f32 1.442695, %v1021_v16 }
 0x32e   : > { %v1162_v20 = vpop.xlane.xlu0 %1161 }
 0x32f   : > { %766 = vrot.lane.b32.xlu1 %v2411_v17, %s2137_s29  ;;  %1842 = vpow2.f32 %v747_v25 }
 0x330   : > { %1829 = vset.pattern.permute.xlu1 %v2138_v18 }
 0x332   : > { %v2488_v19 = vld [vmem:[#allocation4] sm:$0xff] }
 0x333   : > { %v2491_v21 = vmax.f32 %v2488_v19, %v1162_v20  ;;  %905 = vrot.lane.b32.xlu1 %v2411_v17, %s2139_s2 }
 0x335   : > { %v1164_v22 = vsub.f32 %v2488_v19, %v2491_v21  ;;  %1246 = vst.msk [vmem:[#allocation4] sm:$0xff] %vm1181_vm7, %v2491_v21 }
 0x337   : > { %1169 = vperm.xlu1 %1829, %v2491_v21   ;;  %v1165_v6 = vmul.f32 1.442695, %v1164_v22 }
 0x33b   : > { %1048 = vrot.lane.b32.xlu1 %v2411_v17, %s2140_s3  ;;  %s1406_s3 = scalar_lea.hbm %s2622_s11, %s1599_s13 }
 0x33c   : > { %1830 = vset.pattern.permute.xlu1 %v2134_v43  ;;  %v1843_v26 = vpop.eup %1842 }
 0x33d   : > { %v751_v27 = vsel %vm684_vm2, %v1843_v26, 0.0  ;;  %v764_v35 = vpack.c.bf16 %v1843_v26, %v1843_v26 }
 0x33f   : > { %1191 = vrot.lane.b32.xlu1 %v2411_v17, %s2141_s7  ;;  %s1394_s7 = scalar_lea.sflag [#allocation8], %s2357_s5 }
 0x363   : > { %752 = vadd.xlane.f32.xlu1 %v751_v27 }
 0x39c   : > { %v884_v28 = vpop.permute.xlu0 %883 }
 0x39d   : > { %v886_v29 = vsub.f32 %v2443_v47, %v884_v28 }
 0x39f   : > { %v887_v30 = vmul.f32 1.442695, %v886_v29 }
 0x3a1   : > { %1844 = vpow2.f32 %v887_v30 }
 0x3a6   : > { %v1027_v31 = vpop.permute.xlu1 %1026 }
 0x3a7   : > { %v1029_v32 = vsub.f32 %v2447_v54, %v1027_v31 }
 0x3a9   : > { %v1030_v33 = vmul.f32 1.442695, %v1029_v32 }
 0x3aa   : > { %v767_v17 = vpop.permute.xlu1 %766 }
 0x3ab   : > { %1846 = vpow2.f32 %v1030_v33  ;;  %v773_v34 = vsel %vm771_vm8, %v767_v17, 0 }
 0x3ac   : > { %1650 = vmatpush3.bf16.msra.mxu1 %v773_v34 }
 0x3ad   : > { %1661 = vmatprep.subr.bf16.mxu1 %v2128_v0 }
 0x3ae   : > { %v1845_v36 = vpop.eup %1844  ;;  %v906_v37 = vpop.permute.xlu1 %905 }
 0x3af   : > { %v911_v38 = vsel %vm771_vm8, %v906_v37, 0  ;;  %1652 = vmatmul.mubr.msk.bf16.vlgmr.msra.gmra.mxu1 %vm684_vm2, %v764_v35  ;;  %v891_v39 = vsel %vm684_vm2, %v1845_v36, 0.0  ;;  %v904_v44 = vpack.c.bf16 %v1845_v36, %v1845_v36 }
 0x3b0   : > { %1662 = vmatpush3.bf16.msra.mxu1 %v911_v38  ;;  %892 = vadd.xlane.f32.xlu0 %v891_v39 }
 0x3b1   : > { %1663 = vmatprep.mubr.msk.bf16.mxu1 %vm2129_vm1, %v2128_v0  ;;  %1673 = vmatprep.subr.bf16.mxu1 %v2128_v0 }
 0x3b2   : > { %v1170_v40 = vpop.permute.xlu1 %1169 }
 0x3b3   : > { %v1172_v41 = vsub.f32 %v2451_v62, %v1170_v40 }
 0x3b5   : > { %v1173_v42 = vmul.f32 1.442695, %v1172_v41  ;;  %v1840_v41 = vld [vmem:[#allocation15 + $0x8] sm:$0xff]  }
 0x3b6   : > { %v1049_v45 = vpop.permute.xlu1 %1048  ;;  %1692 = vmatpush3.bf16.msra.mxu0 %v1840_v41 }
 0x3b7   : > { %1848 = vpow2.f32 %v1173_v42  ;;  %v1054_v46 = vsel %vm771_vm8, %v1049_v45, 0  ;;  %1664 = vmatmul.mubr.msk.bf16.vlgmr.msra.gmra.mxu1 %vm684_vm2, %v904_v44  ;;  %v1841_v42 = vld [vmem:[#allocation15] sm:$0xff]   ;;  %1693 = vmatprep.subr.bf16.mxu0 %v2128_v0 }
 0x3b8   : > { %v1847_v47 = vpop.eup %1846  ;;  %1674 = vmatpush3.bf16.msra.mxu1 %v1054_v46  ;;  %1675 = vmatprep.mubr.msk.bf16.mxu1 %vm2129_vm1, %v2128_v0  ;;  %1850 = vpow2.f32 %v739_v48 }
 0x3b9   : > { %v1034_v49 = vsel %vm684_vm2, %v1847_v47, 0.0  ;;  %1685 = vmatprep.subr.bf16.mxu1 %v2128_v0  ;;  %v1047_v51 = vpack.c.bf16 %v1847_v47, %v1847_v47  ;;  %1852 = vpow2.f32 %v879_v57 }
 0x3ba   : > { %1035 = vadd.xlane.f32.xlu1 %v1034_v49  ;;  %v1192_v50 = vpop.permute.xlu1 %1191  ;;  %1854 = vpow2.f32 %v1022_v63  ;;  %1694 = vmatpush3.bf16.msra.mxu0 %v1841_v42 }
 0x3bb   : > { %v1197_v52 = vsel %vm771_vm8, %v1192_v50, 0  ;;  %1856 = vpow2.f32 %v1165_v6 }
 0x3bf   : > { %1676 = vmatmul.mubr.msk.bf16.vlgmr.msra.gmra.mxu1 %vm684_vm2, %v1047_v51 }
 0x3c0   : > { %1686 = vmatpush3.bf16.msra.mxu1 %v1197_v52  ;;  %1687 = vmatprep.mubr.msk.bf16.mxu1 %vm2129_vm1, %v2128_v0 }
 0x3c4   : > { %v1849_v53 = vpop.eup %1848 }
 0x3c5   : > { %v1177_v54 = vsel %vm684_vm2, %v1849_v53, 0.0  ;;  %v1190_v55 = vpack.c.bf16 %v1849_v53, %v1849_v53  ;;  %v1851_v56 = vpop.eup %1850 }
 0x3c6   : > { %1178 = vadd.xlane.f32.xlu0 %v1177_v54  ;;  %v1853_v58 = vpop.eup %1852  ;;  %v750_v60 = vmul.f32 %v1851_v56, %v749_v59 }
 0x3c7   : > { %1688 = vmatmul.mubr.msk.bf16.vlgmr.msra.gmra.mxu1 %vm684_vm2, %v1190_v55  ;;  %v1855_v7 = vpop.eup %1854 }
 0x3c8   : > { %v1857_v13 = vpop.eup %1856 }
 0x3cb   : > { %760 = vperm.xlu1 %1830, %v1851_v56  }
 0x3cf   : > { %1831 = vset.pattern.permute.xlu1 %v2136_v8 }
 0x3dc   : > { %900 = vperm.xlu0 %1827, %v1853_v58  }
 0x3ec   : > { %v753_v61 = vpop.xlane.xlu1 %752 }
 0x3ed   : > { %v754_v62 = vadd.f32 %v753_v61, %v750_v60 }
 0x3ef   : > { %756 = vst.msk [vmem:[#allocation5] sm:$0xff] %vm755_vm4, %v754_v62 }
 0x3f6   : > { %v889_v1 = vld [vmem:[#allocation5] sm:$0xff] }
 0x3f7   : > { %v890_v2 = vmul.f32 %v1853_v58, %v889_v1 }
 0x439   : > { %v893_v3 = vpop.xlane.xlu0 %892 }
 0x43a   : > { %v894_v4 = vadd.f32 %v893_v3, %v890_v2 }
 0x43c   : > { %896 = vst.msk [vmem:[#allocation5] sm:$0xff] %vm895_vm5, %v894_v4 }
 0x443   : > { %v1032_v9 = vld [vmem:[#allocation5] sm:$0xff]  ;;  %v1036_v11 = vpop.xlane.xlu1 %1035 }
 0x444   : > { %v1033_v10 = vmul.f32 %v1855_v7, %v1032_v9 }
 0x446   : > { %v1037_v12 = vadd.f32 %v1036_v11, %v1033_v10 }
 0x447   : > { %v761_v24 = vpop.permute.xlu1 %760 }
 0x448   : > { %1039 = vst.msk [vmem:[#allocation5] sm:$0xff] %vm1038_vm6, %v1037_v12  ;;  %v763_v25 = vmul.f32 %v761_v24, %v757_v23 }
 0x44f   : > { %v1175_v14 = vld [vmem:[#allocation5] sm:$0xff]  ;;  %v1179_v16 = vpop.xlane.xlu0 %1178 }
 0x450   : > { %v1176_v15 = vmul.f32 %v1857_v13, %v1175_v14 }
 0x452   : > { %v1180_v20 = vadd.f32 %v1179_v16, %v1176_v15 }
 0x454   : > { %1182 = vst.msk [vmem:[#allocation5] sm:$0xff] %vm1181_vm7, %v1180_v20 }
 0x457   : > { %v901_v44 = vpop.permute.xlu0 %900 }
 0x45b   : > { %v1251_v28 = vld [vmem:[#allocation5] sm:$0xff] }
 0x45c   : > { %1858 = vrcp.f32 %v1251_v28  ;;  %v1597_v28 = vld [vmem:[%s2621_s10] ss:$0 sm:$0xff] }
 0x469   : > { %v1859_v35 = vpop.eup %1858 }
 0x46f   : > { %v809_v19 = vpop.f32.mrf.mxu1 }
 0x470   : > { %v815_v21 = vadd.f32 %v809_v19, %v763_v25 }
 0x471   : > { %v1653_v22 = vpop.f32.mrf.mxu1 }
 0x472   : > { %816 = vst.msk [vmem:[#allocation3] sm:$0xff] %vm684_vm2, %v815_v21 }
 0x473   : > { %v812_v26 = vpop.f32.mrf.mxu1 }
 0x474   : > { %v1596_v26 = vld [vmem:[%s2620_s9] ss:$0 sm:$0xff] }
 0x475   : > { %v1654_v27 = vpop.f32.mrf.mxu1 }
 0x477   : > { %v947_v29 = vpop.f32.mrf.mxu1 }
 0x478   : > { %954 = vrot.lane.b32.xlu1 %v947_v29, %s2142_s21  ;;  %s2022_s21 = scalar_lea.vmem %s1409_s12, 64 }
 0x479   : > { %v1665_v30 = vpop.f32.mrf.mxu1  ;;  %p2023_p2 = scmp.ne.s32.totalorder %s1409_s12, %s2022_s21 }
 0x47b   : > { %v950_v31 = vpop.f32.mrf.mxu1  ;;  %p2024_p13 = pnand %p2023_p2, %p2312_p5 }
 0x47c   : > { %1043 = vperm.xlu1 %1831, %v1855_v7   ;;  %v1592_v7 = vld [vmem:[%s2619_s8] ss:$0 sm:$0xff] }
 0x47d   : > { %v1666_v32 = vpop.f32.mrf.mxu1  ;;  %p2025_p0 = pneg %p2024_p13 }
 0x47f   : > { %v1090_v33 = vpop.f32.mrf.mxu1 }
 0x480   : > { %1832 = vset.pattern.permute.xlu1 %v2138_v18  ;;  %1097 = vrot.lane.b32.xlu0 %v1090_v33, %s2143_s14  ;;  %s2145_s14 = smov [#allocation17]  }
 0x481   : > { %1186 = vperm.xlu1 %1832, %v1857_v13   ;;  %v1677_v17 = vpop.f32.mrf.mxu1 }
 0x483   : > { %v1093_v34 = vpop.f32.mrf.mxu1 }
 0x485   : > { %1833 = vset.pattern.permute.xlu1 %v2134_v43  ;;  %v1678_v36 = vpop.f32.mrf.mxu1  ;;  %v897_v43 = vld [vmem:[#allocation3] sm:$0xff] }
 0x486   : > { %1255 = vperm.xlu1 %1833, %v1859_v35   ;;  %v903_v45 = vmul.f32 %v901_v44, %v897_v43 }
 0x487   : > { %v1233_v37 = vpop.f32.mrf.mxu1 }
 0x488   : > { %1240 = vrot.lane.b32.xlu0 %v1233_v37, %s2144_s25  ;;  %s2026_s25 = sshll.u32 %s2145_s14, 4  ;;  %s2027_s25 = int_to_ptr.vmem [resolvable:$false] %s2026_s25 }
 0x489   : > { %v1689_v38 = vpop.f32.mrf.mxu1  ;;  %s2028_s20 = scalar_lea.vmem %s2027_s25, 128  ;;  %p2029_p1 = scmp.lt.s32.totalorder %s1409_s12, %s2027_s25 }
 0x48a   : > { %1834 = vset.pattern.permute.xlu1 %v2136_v8  ;;  %p2030_p6 = scmp.lt.s32.totalorder %s2028_s20, %s2022_s21 }
 0x48b   : > { %v1236_v39 = vpop.f32.mrf.mxu1  ;;  %1275 = vperm.xlu1 %1834, %v1859_v35  }
 0x48c   : > { %1265 = vperm.xlu0 %1827, %v1859_v35   ;;  %p2031_p3 = por %p2030_p6, %p2029_p1 }
 0x48d   : > { %v1690_v40 = vpop.f32.mrf.mxu1 }
 0x48e   : > { %p2032_p11 = pnand %p2031_p3, %p2025_p0 }
 0x490   : > { %1835 = vset.pattern.permute.xlu0 %v2138_v18 }
 0x491   : > { %1285 = vperm.xlu0 %1835, %v1859_v35  }
 0x4ea   : > { %v955_v46 = vpop.permute.xlu1 %954 }
 0x4eb   : > { %v957_v47 = vadd.f32 %v955_v46, %v903_v45 }
 0x4ed   : > { %959 = vst.msk [vmem:[#allocation3] sm:$0xff] %vm958_vm9, %v957_v47 }
 0x4f2   : > { %v1098_v50 = vpop.permute.xlu0 %1097 }
 0x4f4   : > { %v1040_v48 = vld [vmem:[#allocation3] sm:$0xff] }
 0x4f7   : > { %v1044_v8 = vpop.permute.xlu1 %1043 }
 0x4f8   : > { %v1046_v49 = vmul.f32 %v1044_v8, %v1040_v48 }
 0x4fa   : > { %v1100_v18 = vadd.f32 %v1098_v50, %v1046_v49  ;;  %v1241_v53 = vpop.permute.xlu0 %1240 }
 0x4fc   : > { %1102 = vst.msk [vmem:[#allocation3] sm:$0xff] %vm1101_vm10, %v1100_v18  ;;  %v1187_v51 = vpop.permute.xlu1 %1186 }
 0x501   : > { %v1256_v55 = vpop.permute.xlu1 %1255 }
 0x503   : > { %v1183_v52 = vld [vmem:[#allocation3] sm:$0xff] }
 0x504   : > { %v1189_v0 = vmul.f32 %v1187_v51, %v1183_v52 }
 0x506   : > { %v1243_v54 = vadd.f32 %v1241_v53, %v1189_v0  ;;  %v1276_v61 = vpop.permute.xlu1 %1275 }
 0x507   : > { %v1266_v59 = vpop.permute.xlu0 %1265 }
 0x508   : > { %1245 = vst.msk [vmem:[#allocation3] sm:$0xff] %vm1244_vm11, %v1243_v54 }
 0x50c   : > { %v1286_v2 = vpop.permute.xlu0 %1285 }
 0x50f   : > { %v1250_v56 = vld [vmem:[#allocation3] sm:$0xff] }
 0x510   : > { %v1258_v57 = vmul.f32 %v1256_v55, %v1250_v56 }
 0x512   : > { %1259 = vst.msk [vmem:[#allocation3] sm:$0xff] %vm684_vm2, %v1258_v57 }
 0x519   : > { %v1260_v58 = vld [vmem:[#allocation3] sm:$0xff] }
 0x51a   : > { %v1268_v60 = vmul.f32 %v1266_v59, %v1260_v58 }
 0x51c   : > { %1269 = vst.msk [vmem:[#allocation3] sm:$0xff] %vm958_vm9, %v1268_v60 }
 0x523   : > { %v1270_v62 = vld [vmem:[#allocation3] sm:$0xff] }
 0x524   : > { %v1278_v63 = vmul.f32 %v1276_v61, %v1270_v62 }
 0x526   : > { %1279 = vst.msk [vmem:[#allocation3] sm:$0xff] %vm1101_vm10, %v1278_v63 }
 0x52d   : > { %v1280_v1 = vld [vmem:[#allocation3] sm:$0xff] }
 0x52e   : > { %v1288_v3 = vmul.f32 %v1286_v2, %v1280_v1 }
 0x530   : > { %1289 = vst.msk [vmem:[#allocation3] sm:$0xff] %vm1244_vm11, %v1288_v3 }
 0x537   : > { %v1290_v4 = vld [vmem:[#allocation3] sm:$0xff] }
 0x538   : > { %v1291_v6 = vpack.c.bf16 %v1290_v4, %v1290_v4 }
 0x53a   : > { %1696 = vmatmul.mubr.msk.bf16.vlgmr.msra.gmra.mxu0 %vm562_vm0, %v1291_v6 }
 0x5fa   : > { %v1352_v9 = vpop.f32.mrf.mxu0 }
 0x5fb   : > { %v1353_v10 = vadd.f32 %v1592_v7, %v1352_v9 }
 0x5fc   : > { %v1697_v11 = vpop.f32.mrf.mxu0 }
 0x5fd   : > { %v1359_v12 = vadd.f32 %v1353_v10, %v2392_v5 }
 0x5fe   : > { %v1355_v13 = vpop.f32.mrf.mxu0 }
 0x5ff   : > { %v1362_v14 = vsel %vm562_vm0, %v1359_v12, 0.0 }
 0x600   : > { %1363 = vadd.xlane.f32.xlu1 %v1362_v14  ;;  %v1698_v15 = vpop.f32.mrf.mxu0 }
 0x689   : > { %v1364_v16 = vpop.xlane.xlu1 %1363 }
 0x68a   : > { %v1366_v20 = vmul.f32 0.03125, %v1364_v16 }
 0x68c   : > { %v1367_v23 = vsub.f32 %v1359_v12, %v1366_v20 }
 0x68e   : > { %v1368_v24 = vmul.f32 %v1367_v23, %v1367_v23 }
 0x690   : > { %v1369_v25 = vsel %vm562_vm0, %v1368_v24, 0.0 }
 0x691   : > { %1370 = vadd.xlane.f32.xlu0 %v1369_v25 }
 0x71a   : > { %v1371_v19 = vpop.xlane.xlu0 %1370 }
 0x71b   : > { %v1372_v21 = vmul.f32 0.03125, %v1371_v19 }
 0x71d   : > { %v1373_v22 = vadd.f32 1e-05, %v1372_v21 }
 0x71f   : > { %1860 = vrsqrt.f32 %v1373_v22 }
 0x72c   : > { %v1861_v5 = vpop.eup %1860 }
 0x72d   : > { %v1375_v27 = vmul.f32 %v1861_v5, %v1367_v23 }
 0x72f   : > { %v1382_v29 = vmul.f32 %v1596_v26, %v1375_v27 }
 0x731   : > { %v1389_v30 = vadd.f32 %v1597_v28, %v1382_v29 }
 0x733   : > { %v1390_v31 = vpack.c.bf16 %v1389_v30, %v1389_v30 }
 0x735   : > { %1392 = vst.msk [vmem:[%s531_s26] sm:$0xf] %vm1391_vm12, %v1390_v31 }
 0x736   : > { %2035 = shalt.err (!%p2032_p11)
}
 0x737   : > { %s2036_s0 = scalar_lea.hbm %s1406_s3, 64  ;;  %s2040_s24 = scalar_lea.hbm %s2622_s11, 128 }
 0x738   : > { %p2037_p7 = scmp.ne.s32.totalorder %s1406_s3, %s2036_s0  ;;  %p2041_p10 = scmp.lt.s32.totalorder %s1406_s3, %s2622_s11 }
 0x739   : > { %p2042_p12 = scmp.lt.s32.totalorder %s2040_s24, %s2036_s0 }
 0x73a   : > { %p2038_p4 = pnand %p2037_p7, %p2312_p5 }
 0x73b   : > { %p2043_p2 = por %p2042_p12, %p2041_p10 }
 0x73c   : > { %p2039_p8 = pneg %p2038_p4 }
 0x73e   : > { %p2044_p13 = pnand %p2043_p2, %p2039_p8 }
 0x740   : > { %2047 = shalt.err (!%p2044_p13)
}
 0x741   : > { %1719 = dma.vmem_to_hbm [thread:$0]  (%p2312_p5), %s1409_s12, 64, %s1406_s3, %s1394_s7  }
 0x742 PF: > { %s2657_s16 = sld [smem:[#allocation24_spill]]  ;;  %p2658_p0 = scmp.ge.s32.totalorder %s2118_s22, 2 }
 0x744   : > { %p1742_p1 = pnand %p2658_p0, %p2319_p9 }
 0x746   : > { %p1743_p6 = pneg %p1742_p1 }
 0x748   : > { %s1420_s15 = sand.u32 1, %s2657_s16  }
 0x749   : > { %s1421_s13 = scalar_lea.sflag [#allocation8], %s1420_s15 }
 0x74a   : > { %2093 = dma.done.wait (%p1743_p6), %s1421_s13, 64  }
 0x74b   : > { %2095 = vsyncadd (%p1743_p6), %s1421_s13, 4294967232  ;;  %s32_s22 = sadd.s32 1, %s2118_s22   ;;  %s2659_s26 = sld [smem:[#allocation27_spill]] }
 0x74c   : > { %p29_p3 = scmp.ge.s32.totalorder %s32_s22, 4   ;;  %s2660_s20 = sld [smem:[#allocation25_spill]] }
 0x74d   : > { %s2661_s21 = sld [smem:[#allocation26_spill]]  ;;  %s2662_s17 = smov %s2102_s18 }
 0x74e   : > { %s2663_s18 = smov %s2106_s19  ;;  %31 = sbr.rel (!%p29_p3) target bundleno = 16 (0x10), region = 147 }
 0x751   : > { %s2664_s19 = smov %s2659_s26 }
 0x753   :  { %1426 = vsyncpa [#allocation7], 1 }
 0x754   :  { %1428 = vsyncpa [#allocation7 + $0x1], 1 }
 0x755   :  { %1429 = vsyncpa [#allocation10], 1 }
 0x756   :  { %1431 = vsyncpa [#allocation10 + $0x1], 1 }
 0x757   :  { %1432 = vsyncpa [#allocation13], 1 }
 0x758   :  { %1433 = vsyncpa [#allocation16], 1 }
 0x759   :  { %1434 = vsyncpa [#allocation8], 1 }
 0x75a   :  { %1436 = vsyncpa [#allocation8 + $0x1], 1 }

</bundles_post_ra>
